<compile_context>
chip_gen: v6e
topology: v6e:2x2x1
jax: 0.10.0
libtpu: 0.0.40
codegen_flags: <defaults>
</compile_context>

<pallas_src>
import jax
import jax.numpy as jnp
from jax.experimental import pallas as pl
from jax.experimental.pallas import tpu as pltpu

# Original (PyTorch) layer dims.  Only the final 10-wide output is lane-padded.
DIMS = [28 * 28, 512, 512, 256, 128, 10]
OUT_PAD = 128  # 10 -> 128 for an unmasked lane-dense output store


def _round_up(x, m):
    return ((x + m - 1) // m) * m


def mlp_kernel(x_ref,
               w1_ref, b1_ref,
               w2_ref, b2_ref,
               w3_ref, b3_ref,
               w4_ref, b4_ref,
               w5_ref, b5_ref,
               o_ref):
    """One (TM, 784) f32 batch tile through the whole MLP; weights resident."""
    # Cast to bf16 in-kernel (no separate host-side cast/pad pass over HBM).
    h = x_ref[...].astype(jnp.bfloat16)

    h = jnp.dot(h, w1_ref[...], preferred_element_type=jnp.float32) + b1_ref[...]
    h = jnp.maximum(h, 0.0).astype(jnp.bfloat16)

    h = jnp.dot(h, w2_ref[...], preferred_element_type=jnp.float32) + b2_ref[...]
    h = jnp.maximum(h, 0.0).astype(jnp.bfloat16)

    h = jnp.dot(h, w3_ref[...], preferred_element_type=jnp.float32) + b3_ref[...]
    h = jnp.maximum(h, 0.0).astype(jnp.bfloat16)

    h = jnp.dot(h, w4_ref[...], preferred_element_type=jnp.float32) + b4_ref[...]
    h = jnp.maximum(h, 0.0).astype(jnp.bfloat16)

    logits = jnp.dot(h, w5_ref[...], preferred_element_type=jnp.float32) + b5_ref[...]
    o_ref[...] = logits.astype(o_ref.dtype)  # lane-dense (TM, 128) store


def init_params(key):
    """Mimics nn.Linear's uniform(-1/sqrt(fan_in), +1/sqrt(fan_in)) init."""
    params = []
    for i in range(len(DIMS) - 1):
        fan_in, fan_out = DIMS[i], DIMS[i + 1]
        key, kw, kb = jax.random.split(key, 3)
        bound = 1.0 / (fan_in ** 0.5)
        # stored as (in, out) == PyTorch weight (out, in) transposed
        w = jax.random.uniform(kw, (fan_in, fan_out), jnp.float32, -bound, bound)
        b = jax.random.uniform(kb, (1, fan_out), jnp.float32, -bound, bound)
        params.append((w, b))
    return params


def prepare_params(params):
    """Weights -> bf16 (biases stay f32); last layer out-padded 10 -> 128."""
    prepped = []
    n = len(params)
    for i, (w, b) in enumerate(params):
        out_p = OUT_PAD if i == n - 1 else w.shape[1]
        w_p = jnp.zeros((w.shape[0], out_p), jnp.float32)
        w_p = w_p.at[:, : w.shape[1]].set(w)
        b_p = jnp.zeros((1, out_p), jnp.float32)
        b_p = b_p.at[:, : b.shape[1]].set(b)
        prepped.append((w_p.astype(jnp.bfloat16), b_p))
    return prepped


def neural_network_forward(x, prepped_params):
    """x: (B, 1, 28, 28) or (B, 28, 28) float32 -> logits (B, 10) float32."""
    B = x.shape[0]
    x_flat = x.reshape(B, DIMS[0]).astype(jnp.float32)  # nn.Flatten()

    # Batch tile: multiple of 16 (full bf16 sublane packing), capped at 1024
    # rows (~3 MiB f32 tile).  Prefer >= 2 grid steps so v7x's second
    # TensorCore gets work via the "parallel" grid dimension.
    TM = min(1024, _round_up(B, 16))
    if _round_up(B, TM) // TM == 1 and TM >= 32:
        tm_half = _round_up(TM // 2, 16)
        if _round_up(B, tm_half) // tm_half >= 2:
            TM = tm_half
    B_pad = _round_up(B, TM)

    # Only pad the batch dim (feature dim 784 stays as-is; no cast on host).
    if B_pad != B:
        x_flat = jnp.pad(x_flat, ((0, B_pad - B), (0, 0)))

    flat_params = []
    for w, b in prepped_params:
        flat_params.extend([w, b])

    grid = (B_pad // TM,)

    # Activation tile: last dim 784 equals the full array dim -> legal block.
    in_specs = [pl.BlockSpec((TM, DIMS[0]), lambda i: (i, 0))]
    for w, b in prepped_params:
        # Constant block index across the grid -> weights/biases stay VMEM
        # resident (no re-DMA per batch tile).
        in_specs.append(pl.BlockSpec(w.shape, lambda i: (0, 0)))
        in_specs.append(pl.BlockSpec(b.shape, lambda i: (0, 0)))
    out_spec = pl.BlockSpec((TM, OUT_PAD), lambda i: (i, 0))

    layer_in = [DIMS[0], 512, 512, 256, 128]
    layer_out = [512, 512, 256, 128, OUT_PAD]
    flops = 2 * B_pad * sum(fi * fo for fi, fo in zip(layer_in, layer_out))
    bytes_accessed = (
        sum(a.size * a.dtype.itemsize for a in flat_params)
        + x_flat.size * x_flat.dtype.itemsize
        + B_pad * OUT_PAD * 4
    )

    out = pl.pallas_call(
        mlp_kernel,
        out_shape=jax.ShapeDtypeStruct((B_pad, OUT_PAD), jnp.float32),
        grid=grid,
        in_specs=in_specs,
        out_specs=out_spec,
        compiler_params=pltpu.CompilerParams(
            dimension_semantics=("parallel",),   # shard batch tiles across TCs
            vmem_limit_bytes=32 << 20,           # explicit (v5e default is 16 MiB)
        ),
        cost_estimate=pl.CostEstimate(
            flops=flops, transcendentals=0, bytes_accessed=bytes_accessed),
    )(x_flat, *flat_params)

    # Drop batch padding and the lane padding of the 10-wide logits.
    return out[:B, : DIMS[-1]]


if __name__ == "__main__":
    key = jax.random.PRNGKey(0)
    kx, kp = jax.random.split(key)

    # Small MNIST-like batch: (B, 1, 28, 28)
    B = 8
    x = jax.random.normal(kx, (B, 1, 28, 28), dtype=jnp.float32)

    params = init_params(kp)
    prepped = prepare_params(params)

    logits = neural_network_forward(x, prepped)
    jax.block_until_ready(logits)

    # Plain-JAX reference with the same bf16 weight/activation quantization.
    h = x.reshape(B, -1).astype(jnp.bfloat16)
    ref = None
    for i, (w, b) in enumerate(params):
        acc = jnp.dot(h, w.astype(jnp.bfloat16),
                      preferred_element_type=jnp.float32) + b
        if i < len(params) - 1:
            h = jnp.maximum(acc, 0.0).astype(jnp.bfloat16)
        else:
            ref = acc

    assert logits.shape == (B, 10)
    assert jnp.allclose(logits, ref, atol=1e-2, rtol=1e-2), float(
        jnp.max(jnp.abs(logits - ref)))

    print("KERNEL_OK")
</pallas_src>

<mosaic_0001>
module attributes {stable_mosaic.version = 11 : i64} {
  func.func @mlp_kernel(%arg0: i32, %arg1: memref<16x784xf32, #tpu.memory_space<vmem>>, %arg2: memref<784x512xbf16, #tpu.memory_space<vmem>>, %arg3: memref<1x512xf32, #tpu.memory_space<vmem>>, %arg4: memref<512x512xbf16, #tpu.memory_space<vmem>>, %arg5: memref<1x512xf32, #tpu.memory_space<vmem>>, %arg6: memref<512x256xbf16, #tpu.memory_space<vmem>>, %arg7: memref<1x256xf32, #tpu.memory_space<vmem>>, %arg8: memref<256x128xbf16, #tpu.memory_space<vmem>>, %arg9: memref<1x128xf32, #tpu.memory_space<vmem>>, %arg10: memref<128x128xbf16, #tpu.memory_space<vmem>>, %arg11: memref<1x128xf32, #tpu.memory_space<vmem>>, %arg12: memref<16x128xf32, #tpu.memory_space<vmem>>) attributes {dimension_semantics = [#tpu.dimension_semantics<parallel>], iteration_bounds = array<i64: 1>, scalar_prefetch = 0 : i64, scratch_operands = 0 : i64, tpu.core_type = #tpu.core_type<tc>, window_params = [{transform_indices = @transform_0, window_bounds = array<i64: 16, 784>}, {pipeline_mode = #tpu.pipeline_mode<synchronous>, transform_indices = @transform_1, window_bounds = array<i64: 784, 512>}, {pipeline_mode = #tpu.pipeline_mode<synchronous>, transform_indices = @transform_2, window_bounds = array<i64: 1, 512>}, {pipeline_mode = #tpu.pipeline_mode<synchronous>, transform_indices = @transform_3, window_bounds = array<i64: 512, 512>}, {pipeline_mode = #tpu.pipeline_mode<synchronous>, transform_indices = @transform_4, window_bounds = array<i64: 1, 512>}, {pipeline_mode = #tpu.pipeline_mode<synchronous>, transform_indices = @transform_5, window_bounds = array<i64: 512, 256>}, {pipeline_mode = #tpu.pipeline_mode<synchronous>, transform_indices = @transform_6, window_bounds = array<i64: 1, 256>}, {pipeline_mode = #tpu.pipeline_mode<synchronous>, transform_indices = @transform_7, window_bounds = array<i64: 256, 128>}, {pipeline_mode = #tpu.pipeline_mode<synchronous>, transform_indices = @transform_8, window_bounds = array<i64: 1, 128>}, {pipeline_mode = #tpu.pipeline_mode<synchronous>, transform_indices = @transform_9, window_bounds = array<i64: 128, 128>}, {pipeline_mode = #tpu.pipeline_mode<synchronous>, transform_indices = @transform_10, window_bounds = array<i64: 1, 128>}, {transform_indices = @transform_11, window_bounds = array<i64: 16, 128>}]} {
    %c0 = arith.constant 0 : index
    %c0_0 = arith.constant 0 : index
    %0 = vector.load %arg1[%c0, %c0_0] : memref<16x784xf32, #tpu.memory_space<vmem>>, vector<16x784xf32>
    %1 = arith.truncf %0 : vector<16x784xf32> to vector<16x784xbf16>
    %c0_1 = arith.constant 0 : index
    %c0_2 = arith.constant 0 : index
    %2 = vector.load %arg2[%c0_1, %c0_2] : memref<784x512xbf16, #tpu.memory_space<vmem>>, vector<784x512xbf16>
    %cst = arith.constant dense<0.000000e+00> : vector<16x512xf32>
    %3 = tpu.matmul %1, %2, %cst {dimension_numbers = #tpu.dot_dimension_numbers<[1], [0], [0], [1], [0, 0, 1, 1], [], []>} : vector<16x784xbf16>, vector<784x512xbf16>, vector<16x512xf32> -> vector<16x512xf32>
    %c0_3 = arith.constant 0 : index
    %c0_4 = arith.constant 0 : index
    %4 = vector.load %arg3[%c0_3, %c0_4] : memref<1x512xf32, #tpu.memory_space<vmem>>, vector<1x512xf32>
    %5 = vector.broadcast %4 : vector<1x512xf32> to vector<16x512xf32>
    %6 = arith.addf %3, %5 : vector<16x512xf32>
    %cst_5 = arith.constant 0.000000e+00 : f32
    %7 = vector.broadcast %cst_5 : f32 to vector<16x512xf32>
    %8 = arith.maximumf %6, %7 : vector<16x512xf32>
    %9 = arith.truncf %8 : vector<16x512xf32> to vector<16x512xbf16>
    %c0_6 = arith.constant 0 : index
    %c0_7 = arith.constant 0 : index
    %10 = vector.load %arg4[%c0_6, %c0_7] : memref<512x512xbf16, #tpu.memory_space<vmem>>, vector<512x512xbf16>
    %cst_8 = arith.constant dense<0.000000e+00> : vector<16x512xf32>
    %11 = tpu.matmul %9, %10, %cst_8 {dimension_numbers = #tpu.dot_dimension_numbers<[1], [0], [0], [1], [0, 0, 1, 1], [], []>} : vector<16x512xbf16>, vector<512x512xbf16>, vector<16x512xf32> -> vector<16x512xf32>
    %c0_9 = arith.constant 0 : index
    %c0_10 = arith.constant 0 : index
    %12 = vector.load %arg5[%c0_9, %c0_10] : memref<1x512xf32, #tpu.memory_space<vmem>>, vector<1x512xf32>
    %13 = vector.broadcast %12 : vector<1x512xf32> to vector<16x512xf32>
    %14 = arith.addf %11, %13 : vector<16x512xf32>
    %cst_11 = arith.constant 0.000000e+00 : f32
    %15 = vector.broadcast %cst_11 : f32 to vector<16x512xf32>
    %16 = arith.maximumf %14, %15 : vector<16x512xf32>
    %17 = arith.truncf %16 : vector<16x512xf32> to vector<16x512xbf16>
    %c0_12 = arith.constant 0 : index
    %c0_13 = arith.constant 0 : index
    %18 = vector.load %arg6[%c0_12, %c0_13] : memref<512x256xbf16, #tpu.memory_space<vmem>>, vector<512x256xbf16>
    %cst_14 = arith.constant dense<0.000000e+00> : vector<16x256xf32>
    %19 = tpu.matmul %17, %18, %cst_14 {dimension_numbers = #tpu.dot_dimension_numbers<[1], [0], [0], [1], [0, 0, 1, 1], [], []>} : vector<16x512xbf16>, vector<512x256xbf16>, vector<16x256xf32> -> vector<16x256xf32>
    %c0_15 = arith.constant 0 : index
    %c0_16 = arith.constant 0 : index
    %20 = vector.load %arg7[%c0_15, %c0_16] : memref<1x256xf32, #tpu.memory_space<vmem>>, vector<1x256xf32>
    %21 = vector.broadcast %20 : vector<1x256xf32> to vector<16x256xf32>
    %22 = arith.addf %19, %21 : vector<16x256xf32>
    %cst_17 = arith.constant 0.000000e+00 : f32
    %23 = vector.broadcast %cst_17 : f32 to vector<16x256xf32>
    %24 = arith.maximumf %22, %23 : vector<16x256xf32>
    %25 = arith.truncf %24 : vector<16x256xf32> to vector<16x256xbf16>
    %c0_18 = arith.constant 0 : index
    %c0_19 = arith.constant 0 : index
    %26 = vector.load %arg8[%c0_18, %c0_19] : memref<256x128xbf16, #tpu.memory_space<vmem>>, vector<256x128xbf16>
    %cst_20 = arith.constant dense<0.000000e+00> : vector<16x128xf32>
    %27 = tpu.matmul %25, %26, %cst_20 {dimension_numbers = #tpu.dot_dimension_numbers<[1], [0], [0], [1], [0, 0, 1, 1], [], []>} : vector<16x256xbf16>, vector<256x128xbf16>, vector<16x128xf32> -> vector<16x128xf32>
    %c0_21 = arith.constant 0 : index
    %c0_22 = arith.constant 0 : index
    %28 = vector.load %arg9[%c0_21, %c0_22] : memref<1x128xf32, #tpu.memory_space<vmem>>, vector<1x128xf32>
    %29 = vector.broadcast %28 : vector<1x128xf32> to vector<16x128xf32>
    %30 = arith.addf %27, %29 : vector<16x128xf32>
    %cst_23 = arith.constant 0.000000e+00 : f32
    %31 = vector.broadcast %cst_23 : f32 to vector<16x128xf32>
    %32 = arith.maximumf %30, %31 : vector<16x128xf32>
    %33 = arith.truncf %32 : vector<16x128xf32> to vector<16x128xbf16>
    %c0_24 = arith.constant 0 : index
    %c0_25 = arith.constant 0 : index
    %34 = vector.load %arg10[%c0_24, %c0_25] : memref<128x128xbf16, #tpu.memory_space<vmem>>, vector<128x128xbf16>
    %cst_26 = arith.constant dense<0.000000e+00> : vector<16x128xf32>
    %35 = tpu.matmul %33, %34, %cst_26 {dimension_numbers = #tpu.dot_dimension_numbers<[1], [0], [0], [1], [0, 0, 1, 1], [], []>} : vector<16x128xbf16>, vector<128x128xbf16>, vector<16x128xf32> -> vector<16x128xf32>
    %c0_27 = arith.constant 0 : index
    %c0_28 = arith.constant 0 : index
    %36 = vector.load %arg11[%c0_27, %c0_28] : memref<1x128xf32, #tpu.memory_space<vmem>>, vector<1x128xf32>
    %37 = vector.broadcast %36 : vector<1x128xf32> to vector<16x128xf32>
    %38 = arith.addf %35, %37 : vector<16x128xf32>
    %c0_29 = arith.constant 0 : index
    %c0_30 = arith.constant 0 : index
    %39 = vector.load %arg12[%c0_29, %c0_30] : memref<16x128xf32, #tpu.memory_space<vmem>>, vector<16x128xf32>
    tpu.vector_store %arg12[%c0_29, %c0_30], %38 {strides = array<i32>} : memref<16x128xf32, #tpu.memory_space<vmem>>, vector<16x128xf32>,
    return
  }
  func.func @transform_0(%arg0: i32) -> (i32, i32) {
    %c0_i32 = arith.constant 0 : i32
    %c0_i32_0 = arith.constant 0 : i32
    return %arg0, %c0_i32 : i32, i32
  }
  func.func @transform_1(%arg0: i32) -> (i32, i32) {
    %c0_i32 = arith.constant 0 : i32
    %c0_i32_0 = arith.constant 0 : i32
    %c0_i32_1 = arith.constant 0 : i32
    return %c0_i32, %c0_i32_0 : i32, i32
  }
  func.func @transform_2(%arg0: i32) -> (i32, i32) {
    %c0_i32 = arith.constant 0 : i32
    %c0_i32_0 = arith.constant 0 : i32
    %c0_i32_1 = arith.constant 0 : i32
    return %c0_i32, %c0_i32_0 : i32, i32
  }
  func.func @transform_3(%arg0: i32) -> (i32, i32) {
    %c0_i32 = arith.constant 0 : i32
    %c0_i32_0 = arith.constant 0 : i32
    %c0_i32_1 = arith.constant 0 : i32
    return %c0_i32, %c0_i32_0 : i32, i32
  }
  func.func @transform_4(%arg0: i32) -> (i32, i32) {
    %c0_i32 = arith.constant 0 : i32
    %c0_i32_0 = arith.constant 0 : i32
    %c0_i32_1 = arith.constant 0 : i32
    return %c0_i32, %c0_i32_0 : i32, i32
  }
  func.func @transform_5(%arg0: i32) -> (i32, i32) {
    %c0_i32 = arith.constant 0 : i32
    %c0_i32_0 = arith.constant 0 : i32
    %c0_i32_1 = arith.constant 0 : i32
    return %c0_i32, %c0_i32_0 : i32, i32
  }
  func.func @transform_6(%arg0: i32) -> (i32, i32) {
    %c0_i32 = arith.constant 0 : i32
    %c0_i32_0 = arith.constant 0 : i32
    %c0_i32_1 = arith.constant 0 : i32
    return %c0_i32, %c0_i32_0 : i32, i32
  }
  func.func @transform_7(%arg0: i32) -> (i32, i32) {
    %c0_i32 = arith.constant 0 : i32
    %c0_i32_0 = arith.constant 0 : i32
    %c0_i32_1 = arith.constant 0 : i32
    return %c0_i32, %c0_i32_0 : i32, i32
  }
  func.func @transform_8(%arg0: i32) -> (i32, i32) {
    %c0_i32 = arith.constant 0 : i32
    %c0_i32_0 = arith.constant 0 : i32
    %c0_i32_1 = arith.constant 0 : i32
    return %c0_i32, %c0_i32_0 : i32, i32
  }
  func.func @transform_9(%arg0: i32) -> (i32, i32) {
    %c0_i32 = arith.constant 0 : i32
    %c0_i32_0 = arith.constant 0 : i32
    %c0_i32_1 = arith.constant 0 : i32
    return %c0_i32, %c0_i32_0 : i32, i32
  }
  func.func @transform_10(%arg0: i32) -> (i32, i32) {
    %c0_i32 = arith.constant 0 : i32
    %c0_i32_0 = arith.constant 0 : i32
    %c0_i32_1 = arith.constant 0 : i32
    return %c0_i32, %c0_i32_0 : i32, i32
  }
  func.func @transform_11(%arg0: i32) -> (i32, i32) {
    %c0_i32 = arith.constant 0 : i32
    %c0_i32_0 = arith.constant 0 : i32
    return %arg0, %c0_i32 : i32, i32
  }
}

</mosaic_0001>

<bundles_post_ra>
// kernel: tpu_custom_call.1
= control target key start
LH: loop header
LB: loop body
LE: loop exit
PB: predicated region body
PF: predicated region fallthrough
CT: control target
= control target key end

     0   :  { %16 = vsyncpa [#allocation3], 0  ;;  %s4946_s0 = inlined_call_operand.hbm [shape: f32[16,784], index: 0, kind: input, shape index: {}]   ;;  %s4947_s1 = inlined_call_operand.hbm [shape: bf16[784,512], index: 1, kind: input, shape index: {}]   ;;  %s4948_s2 = inlined_call_operand.hbm [shape: f32[1,512], index: 2, kind: input, shape index: {}]   ;;  %s4949_s3 = inlined_call_operand.hbm [shape: bf16[512,512], index: 3, kind: input, shape index: {}]   ;;  %s4950_s4 = inlined_call_operand.vmem [shape: f32[1,512], index: 4, kind: input, shape index: {}]   ;;  %s4951_s5 = inlined_call_operand.hbm [shape: bf16[512,256], index: 5, kind: input, shape index: {}]   ;;  %s4952_s6 = inlined_call_operand.vmem [shape: f32[1,256], index: 6, kind: input, shape index: {}]   ;;  %s4953_s7 = inlined_call_operand.hbm [shape: bf16[256,128], index: 7, kind: input, shape index: {}]   ;;  %s4954_s8 = inlined_call_operand.vmem [shape: f32[1,128], index: 8, kind: input, shape index: {}]   ;;  %s4955_s9 = inlined_call_operand.hbm [shape: bf16[128,128], index: 9, kind: input, shape index: {}]   ;;  %s4956_s10 = inlined_call_operand.vmem [shape: f32[1,128], index: 10, kind: input, shape index: {}]   ;;  %s4957_s11 = inlined_call_operand.hbm [shape: f32[16,128], index: 11, kind: output, shape index: {}]  }
   0x1   :  { %17 = vsyncpa [#allocation6], 0 }
   0x2   :  { %18 = vsyncpa [#allocation9], 0 }
   0x3   :  { %19 = vsyncpa [#allocation12], 0 }
   0x4   :  { %20 = vsyncpa [#allocation4], 0  ;;  %s4749_s17 = smov [#allocation5]  }
   0x5   :  { %s38_s18 = sshll.u32 %s4749_s17, 4  ;;  %s39_s18 = int_to_ptr.vmem [resolvable:$true] %s38_s18 }
   0x6   :  { %s4587_s19 = scalar_lea.vmem %s39_s18, 25088  ;;  %p4592_p1 = scmp.lt.s32.totalorder %s39_s18, %s39_s18 }
   0x7   :  { %p4588_p0 = scmp.ne.s32.totalorder %s39_s18, %s4587_s19  ;;  %p4593_p2 = scmp.lt.s32.totalorder %s4587_s19, %s4587_s19 }
   0x9   :  { %p4594_p3 = por %p4593_p2, %p4592_p1 }
   0xb   :  { %p4595_p4 = pnand %p4594_p3, %p4588_p0 }
   0xd   :  { %4598 = shalt.err (!%p4595_p4)
}
   0xe   :  { %s4750_s20 = smov 256   ;;  %s4751_s21 = smov 16  }
   0xf   :  { %44 = dma.hbm_to_vmem [thread:$0]  %s4947_s1, 25088, %s39_s18, [#allocation6], %s4750_s20, %s4750_s20, %s4751_s21  }
  0x10   :  { %s4752_s24 = smov [#allocation8]   ;;  %s4753_s26 = smov [#allocation11]  }
  0x11   :  { %s60_s25 = sshll.u32 %s4752_s24, 4  ;;  %s88_s27 = sshll.u32 %s4753_s26, 4  ;;  %s61_s25 = int_to_ptr.vmem [resolvable:$true] %s60_s25  ;;  %s89_s27 = int_to_ptr.vmem [resolvable:$true] %s88_s27 }
  0x12   :  { %s4607_s28 = scalar_lea.vmem %s61_s25, 16384  ;;  %p4612_p6 = scmp.lt.s32.totalorder %s61_s25, %s61_s25 }
  0x13   :  { %p4608_p5 = scmp.ne.s32.totalorder %s61_s25, %s4607_s28  ;;  %p4613_p7 = scmp.lt.s32.totalorder %s4607_s28, %s4607_s28 }
  0x15   :  { %p4614_p8 = por %p4613_p7, %p4612_p6 }
  0x17   :  { %p4615_p9 = pnand %p4614_p8, %p4608_p5 }
  0x19   :  { %4618 = shalt.err (!%p4615_p9)
}
  0x1a   :  { %66 = dma.hbm_to_vmem [thread:$0]  %s4949_s3, 16384, %s61_s25, [#allocation9], %s4750_s20, %s4750_s20, %s4751_s21  }
  0x1b   :  { %s4627_s12 = scalar_lea.vmem %s89_s27, 2048  ;;  %p4632_p11 = scmp.lt.s32.totalorder %s89_s27, %s89_s27 }
  0x1c   :  { %p4628_p10 = scmp.ne.s32.totalorder %s89_s27, %s4627_s12  ;;  %p4633_p12 = scmp.lt.s32.totalorder %s4627_s12, %s4627_s12 }
  0x1e   :  { %p4634_p13 = por %p4633_p12, %p4632_p11 }
  0x20   :  { %p4635_p0 = pnand %p4634_p13, %p4628_p10 }
  0x22   :  { %4638 = shalt.err (!%p4635_p0)
}
  0x23   :  { %s4754_s1 = smov 64   ;;  %s4755_s13 = smov 4  }
  0x24   :  { %94 = dma.hbm_to_vmem [thread:$0]  %s4953_s7, 2048, %s89_s27, [#allocation12], %s4754_s1, %s4754_s1, %s4755_s13  }
  0x25   :  { %s4756_s16 = smov [#allocation2]  }
  0x26   :  { %s26_s17 = sshll.u32 %s4756_s16, 4  ;;  %s27_s17 = int_to_ptr.vmem [resolvable:$true] %s26_s17 }
  0x27   :  { %s4647_s3 = scalar_lea.vmem %s27_s17, 1792  ;;  %p4652_p2 = scmp.lt.s32.totalorder %s27_s17, %s27_s17 }
  0x28   :  { %p4648_p1 = scmp.ne.s32.totalorder %s27_s17, %s4647_s3  ;;  %p4653_p3 = scmp.lt.s32.totalorder %s4647_s3, %s4647_s3 }
  0x2a   :  { %p4654_p4 = por %p4653_p3, %p4652_p2 }
  0x2c   :  { %p4655_p5 = pnand %p4654_p4, %p4648_p1 }
  0x2e   :  { %4658 = shalt.err (!%p4655_p5)
}
  0x2f   :  { %s4757_s18 = smov 896   ;;  %s4758_s19 = smov 56  }
  0x30   :  { %32 = dma.hbm_to_vmem [thread:$0]  %s4946_s0, 1792, %s27_s17, [#allocation3], %s4757_s18, %s4757_s18, %s4758_s19  }
  0x31   :  { %s4759_s22 = smov [#allocation7]   ;;  %s4760_s24 = smov [#allocation10]  }
  0x32   :  { %s51_s23 = sshll.u32 %s4759_s22, 4  ;;  %s74_s7 = sshll.u32 %s4760_s24, 4  ;;  %s52_s23 = int_to_ptr.vmem [resolvable:$true] %s51_s23  ;;  %s75_s7 = int_to_ptr.vmem [resolvable:$true] %s74_s7 }
  0x33   :  { %s4667_s25 = scalar_lea.vmem %s52_s23, 64  ;;  %p4672_p7 = scmp.lt.s32.totalorder %s52_s23, %s52_s23 }
  0x34   :  { %p4668_p6 = scmp.ne.s32.totalorder %s52_s23, %s4667_s25  ;;  %p4673_p8 = scmp.lt.s32.totalorder %s4667_s25, %s4667_s25 }
  0x36   :  { %p4674_p9 = por %p4673_p8, %p4672_p7 }
  0x38   :  { %p4675_p10 = pnand %p4674_p9, %p4668_p6 }
  0x3a   :  { %4678 = shalt.err (!%p4675_p10)
}
  0x3b   :  { %54 = dma.hbm_to_vmem [thread:$0]  %s4948_s2, 64, %s52_s23, [#allocation6]  }
  0x3c   :  { %s4687_s28 = scalar_lea.vmem %s75_s7, 8192  ;;  %p4692_p12 = scmp.lt.s32.totalorder %s75_s7, %s75_s7 }
  0x3d   :  { %p4688_p11 = scmp.ne.s32.totalorder %s75_s7, %s4687_s28  ;;  %p4693_p13 = scmp.lt.s32.totalorder %s4687_s28, %s4687_s28 }
  0x3f   :  { %p4694_p0 = por %p4693_p13, %p4692_p12 }
  0x41   :  { %p4695_p1 = pnand %p4694_p0, %p4688_p11 }
  0x43   :  { %4698 = shalt.err (!%p4695_p1)
}
  0x44   :  { %s4761_s0 = smov 128   ;;  %s4762_s29 = smov 8  }
  0x45   :  { %80 = dma.hbm_to_vmem [thread:$0]  %s4951_s5, 8192, %s75_s7, [#allocation9], %s4761_s0, %s4761_s0, %s4762_s29  }
  0x46   :  { %s4763_s14 = smov [#allocation13]  }
  0x47   :  { %s102_s15 = sshll.u32 %s4763_s14, 4  ;;  %s103_s15 = int_to_ptr.vmem [resolvable:$true] %s102_s15 }
  0x48   :  { %s4707_s2 = scalar_lea.vmem %s103_s15, 1024  ;;  %p4712_p3 = scmp.lt.s32.totalorder %s103_s15, %s103_s15 }
  0x49   :  { %p4708_p2 = scmp.ne.s32.totalorder %s103_s15, %s4707_s2  ;;  %p4713_p4 = scmp.lt.s32.totalorder %s4707_s2, %s4707_s2 }
  0x4b   :  { %p4714_p5 = por %p4713_p4, %p4712_p3 }
  0x4d   :  { %p4715_p6 = pnand %p4714_p5, %p4708_p2 }
  0x4f   :  { %4718 = shalt.err (!%p4715_p6)
}
  0x50   :  { %108 = dma.hbm_to_vmem [thread:$0]  %s4955_s9, 1024, %s103_s15, [#allocation12], %s4754_s1, %s4754_s1, %s4755_s13  }
  0x51   :  { %4739 = dma.done.wait [#allocation3], 1792  }
  0x52   :  { %4740 = vsyncadd [#allocation3], 4294965504 }
  0x53   :  { %4741 = dma.done.wait [#allocation6], 25152  }
  0x54   :  { %4742 = vsyncadd [#allocation6], 4294942144 }
  0x55   :  { %4743 = dma.done.wait [#allocation9], 24576  }
  0x56   :  { %4744 = vsyncadd [#allocation9], 4294942720 }
  0x57   :  { %4745 = dma.done.wait [#allocation12], 3072  }
  0x58   :  { %4746 = vsyncadd [#allocation12], 4294964224  ;;  %v3973_v0 = vld [vmem:[#allocation5 + $0xe4] ss:$16 sps:$4 sm:$0xff]   ;;  %v3977_v2 = vld [vmem:[#allocation5 + $0xe0] ss:$16 sps:$4 sm:$0xff]  }
  0x59   :  { %v3975_v1 = vld [vmem:[#allocation5 + $0x2e4] ss:$16 sps:$4 sm:$0xff]   ;;  %1356 = vmatprep.subr.bf16.mxu0 %v3973_v0  ;;  %v3978_v3 = vld [vmem:[#allocation5 + $0x2e0] ss:$16 sps:$4 sm:$0xff]   ;;  %v134_v46 = vld [vmem:[#allocation2 + $0x8] sm:$0xff]  ;;  %vm1352_vm0 = vcmask 130048  }
  0x5a   :  { %1399 = vmatprep.subr.bf16.mxu1 %v3975_v1  ;;  %v3979_v4 = vld [vmem:[#allocation5 + $0xc4] ss:$16 sps:$4 sm:$0xff]   ;;  %1357 = vmatpush1.bf16.msra.mxu0 %v3977_v2  ;;  %v3983_v6 = vld [vmem:[#allocation5 + $0xc0] ss:$16 sps:$4 sm:$0xff]   ;;  %v136_v48 = vld [vmem:[#allocation2 + $0x18] sm:$0xff]  ;;  %vm4766_vm1 = vmmov 0  }
  0x5b   :  { %1400 = vmatpush1.bf16.msra.mxu1 %v3978_v3  ;;  %v3981_v5 = vld [vmem:[#allocation5 + $0x2c4] ss:$16 sps:$4 sm:$0xff]   ;;  %1358 = vmatprep.subr.bf16.mxu0 %v3979_v4  ;;  %v3984_v7 = vld [vmem:[#allocation5 + $0x2c0] ss:$16 sps:$4 sm:$0xff]   ;;  %s4767_s19 = smov [#allocation14]  }
  0x5c   :  { %1401 = vmatprep.subr.bf16.mxu1 %v3981_v5  ;;  %v3985_v8 = vld [vmem:[#allocation5 + $0xa4] ss:$16 sps:$4 sm:$0xff]   ;;  %v3989_v10 = vld [vmem:[#allocation5 + $0xa0] ss:$16 sps:$4 sm:$0xff]   ;;  %s3472_s20 = sshll.u32 %s4767_s19, 4  ;;  %s3473_s20 = int_to_ptr.vmem [resolvable:$true] %s3472_s20 }
  0x5d   :  { %v3987_v9 = vld [vmem:[#allocation5 + $0x2a4] ss:$16 sps:$4 sm:$0xff]   ;;  %v3990_v11 = vld [vmem:[#allocation5 + $0x2a0] ss:$16 sps:$4 sm:$0xff]   ;;  %p4724_p8 = scmp.lt.s32.totalorder %s3473_s20, %s3473_s20 }
  0x5e   :  { %1359 = vmatpush1.bf16.msra.mxu0 %v3983_v6  ;;  %v3991_v12 = vld [vmem:[#allocation5 + $0x84] ss:$16 sps:$4 sm:$0xff]   ;;  %v3995_v14 = vld [vmem:[#allocation5 + $0x80] ss:$16 sps:$4 sm:$0xff]  }
  0x5f   :  { %1402 = vmatpush1.bf16.msra.mxu1 %v3984_v7  ;;  %1360 = vmatprep.subr.bf16.mxu0 %v3985_v8  ;;  %v3993_v13 = vld [vmem:[#allocation5 + $0x284] ss:$16 sps:$4 sm:$0xff]   ;;  %v3996_v15 = vld [vmem:[#allocation5 + $0x280] ss:$16 sps:$4 sm:$0xff]   ;;  %v140_v7 = vld [vmem:[#allocation2 + $0x38] sm:$0xff] }
  0x60   :  { %1403 = vmatprep.subr.bf16.mxu1 %v3987_v9  ;;  %v3997_v16 = vld [vmem:[#allocation5 + $0x64] ss:$16 sps:$4 sm:$0xff]   ;;  %v4001_v18 = vld [vmem:[#allocation5 + $0x60] ss:$16 sps:$4 sm:$0xff]   ;;  %v142_v9 = vld [vmem:[#allocation2 + $0x48] sm:$0xff] }
  0x61   :  { %v3999_v17 = vld [vmem:[#allocation5 + $0x264] ss:$16 sps:$4 sm:$0xff]   ;;  %v4002_v19 = vld [vmem:[#allocation5 + $0x260] ss:$16 sps:$4 sm:$0xff]  }
  0x62   :  { %1361 = vmatpush1.bf16.msra.mxu0 %v3989_v10  ;;  %v4003_v20 = vld [vmem:[#allocation5 + $0x44] ss:$16 sps:$4 sm:$0xff]   ;;  %v4007_v22 = vld [vmem:[#allocation5 + $0x40] ss:$16 sps:$4 sm:$0xff]  }
  0x63   :  { %1404 = vmatpush1.bf16.msra.mxu1 %v3990_v11  ;;  %1362 = vmatprep.subr.bf16.mxu0 %v3991_v12  ;;  %v4005_v21 = vld [vmem:[#allocation5 + $0x244] ss:$16 sps:$4 sm:$0xff]   ;;  %v4008_v23 = vld [vmem:[#allocation5 + $0x240] ss:$16 sps:$4 sm:$0xff]  }
  0x64   :  { %1405 = vmatprep.subr.bf16.mxu1 %v3993_v13  ;;  %v4009_v24 = vld [vmem:[#allocation5 + $0x24] ss:$16 sps:$4 sm:$0xff]   ;;  %v4013_v26 = vld [vmem:[#allocation5 + $0x20] ss:$16 sps:$4 sm:$0xff]  }
  0x65   :  { %v4011_v25 = vld [vmem:[#allocation5 + $0x224] ss:$16 sps:$4 sm:$0xff]   ;;  %v4014_v27 = vld [vmem:[#allocation5 + $0x220] ss:$16 sps:$4 sm:$0xff]  }
  0x66   :  { %1363 = vmatpush1.bf16.msra.mxu0 %v3995_v14  ;;  %v4015_v28 = vld [vmem:[#allocation5 + $0x4] ss:$16 sps:$4 sm:$0xff]   ;;  %v4019_v30 = vld [vmem:[#allocation5] ss:$16 sps:$4 sm:$0xff]  }
  0x67   :  { %1406 = vmatpush1.bf16.msra.mxu1 %v3996_v15  ;;  %1364 = vmatprep.subr.bf16.mxu0 %v3997_v16  ;;  %v4017_v29 = vld [vmem:[#allocation5 + $0x204] ss:$16 sps:$4 sm:$0xff]   ;;  %v4020_v31 = vld [vmem:[#allocation5 + $0x200] ss:$16 sps:$4 sm:$0xff]  }
  0x68   :  { %1407 = vmatprep.subr.bf16.mxu1 %v3999_v17  ;;  %v4021_v32 = vld [vmem:[#allocation5 + $0x1e4] ss:$16 sps:$4 sm:$0xff]   ;;  %v4025_v34 = vld [vmem:[#allocation5 + $0x1e0] ss:$16 sps:$4 sm:$0xff]   ;;  %v4080_v17 = vld [vmem:[#allocation5 + $0xec] ss:$16 sps:$4 sm:$0xff]  }
  0x69   :  { %v4023_v33 = vld [vmem:[#allocation5 + $0x3e4] ss:$16 sps:$4 sm:$0xff]   ;;  %v4026_v35 = vld [vmem:[#allocation5 + $0x3e0] ss:$16 sps:$4 sm:$0xff]  }
  0x6a   :  { %1365 = vmatpush1.bf16.msra.mxu0 %v4001_v18  ;;  %v4027_v36 = vld [vmem:[#allocation5 + $0x1c4] ss:$16 sps:$4 sm:$0xff]   ;;  %v4031_v38 = vld [vmem:[#allocation5 + $0x1c0] ss:$16 sps:$4 sm:$0xff]  }
  0x6b   :  { %1408 = vmatpush1.bf16.msra.mxu1 %v4002_v19  ;;  %1366 = vmatprep.subr.bf16.mxu0 %v4003_v20  ;;  %v4029_v37 = vld [vmem:[#allocation5 + $0x3c4] ss:$16 sps:$4 sm:$0xff]   ;;  %v4032_v39 = vld [vmem:[#allocation5 + $0x3c0] ss:$16 sps:$4 sm:$0xff]   ;;  %v146_v20 = vld [vmem:[#allocation2 + $0x68] sm:$0xff] }
  0x6c   :  { %1409 = vmatprep.subr.bf16.mxu1 %v4005_v21  ;;  %v4033_v40 = vld [vmem:[#allocation5 + $0x1a4] ss:$16 sps:$4 sm:$0xff]   ;;  %v4037_v42 = vld [vmem:[#allocation5 + $0x1a0] ss:$16 sps:$4 sm:$0xff]   ;;  %v4764_v21 = vmov 0  }
  0x6d   :  { %v4035_v41 = vld [vmem:[#allocation5 + $0x3a4] ss:$16 sps:$4 sm:$0xff]   ;;  %v4038_v43 = vld [vmem:[#allocation5 + $0x3a0] ss:$16 sps:$4 sm:$0xff]  }
  0x6e   :  { %1367 = vmatpush1.bf16.msra.mxu0 %v4007_v22  ;;  %v4039_v44 = vld [vmem:[#allocation5 + $0x184] ss:$16 sps:$4 sm:$0xff]   ;;  %v4043_v50 = vld [vmem:[#allocation5 + $0x180] ss:$16 sps:$4 sm:$0xff]  }
  0x6f   :  { %1410 = vmatpush1.bf16.msra.mxu1 %v4008_v23  ;;  %1368 = vmatprep.subr.bf16.mxu0 %v4009_v24  ;;  %v4041_v45 = vld [vmem:[#allocation5 + $0x384] ss:$16 sps:$4 sm:$0xff]   ;;  %v4044_v51 = vld [vmem:[#allocation5 + $0x380] ss:$16 sps:$4 sm:$0xff]   ;;  %v4078_v24 = vld [vmem:[#allocation5 + $0xe8] ss:$16 sps:$4 sm:$0xff]  }
  0x70   :  { %1411 = vmatprep.subr.bf16.mxu1 %v4011_v25  ;;  %v141_v47 = vld [vmem:[#allocation2 + $0x40] sm:$0xff]  ;;  %v143_v49 = vld [vmem:[#allocation2 + $0x50] sm:$0xff] }
  0x71   :  { %v4045_v52 = vld [vmem:[#allocation5 + $0x164] ss:$16 sps:$4 sm:$0xff]   ;;  %v4858_v53 = vpack.c.bf16 %v141_v47, %v134_v46  ;;  %v4860_v54 = vpack.c.bf16 %v143_v49, %v136_v48  ;;  %v4049_v56 = vld [vmem:[#allocation5 + $0x160] ss:$16 sps:$4 sm:$0xff]   ;;  %v4108_v47 = vld [vmem:[#allocation5 + $0x48] ss:$16 sps:$4 sm:$0xff]  }
  0x72   :  { %1369 = vmatpush1.bf16.msra.mxu0 %v4013_v26  ;;  %v4047_v55 = vld [vmem:[#allocation5 + $0x364] ss:$16 sps:$4 sm:$0xff]   ;;  %v4050_v57 = vld [vmem:[#allocation5 + $0x360] ss:$16 sps:$4 sm:$0xff]   ;;  %v4086_v26 = vld [vmem:[#allocation5 + $0xcc] ss:$16 sps:$4 sm:$0xff]  }
  0x73   :  { %1412 = vmatpush1.bf16.msra.mxu1 %v4014_v27  ;;  %1370 = vmatprep.subr.bf16.mxu0 %v4015_v28  ;;  %v4051_v58 = vld [vmem:[#allocation5 + $0x144] ss:$16 sps:$4 sm:$0xff]   ;;  %v4055_v60 = vld [vmem:[#allocation5 + $0x140] ss:$16 sps:$4 sm:$0xff]   ;;  %v4084_v28 = vld [vmem:[#allocation5 + $0xc8] ss:$16 sps:$4 sm:$0xff]  }
  0x74   :  { %1413 = vmatprep.subr.bf16.mxu1 %v4017_v29  ;;  %1388 = vmatprep.mubr.bf16.mxu0 %v4858_v53  ;;  %v4053_v59 = vld [vmem:[#allocation5 + $0x344] ss:$16 sps:$4 sm:$0xff]   ;;  %v4056_v61 = vld [vmem:[#allocation5 + $0x340] ss:$16 sps:$4 sm:$0xff]   ;;  %v4116_v49 = vld [vmem:[#allocation5 + $0x2c] ss:$16 sps:$4 sm:$0xff]  }
  0x75   :  { %1431 = vmatprep.mubr.bf16.mxu1 %v4860_v54  ;;  %v4057_v62 = vld [vmem:[#allocation5 + $0x124] ss:$16 sps:$4 sm:$0xff]   ;;  %v4061_v0 = vld [vmem:[#allocation5 + $0x120] ss:$16 sps:$4 sm:$0xff]  }
  0x76   :  { %1371 = vmatpush1.bf16.msra.mxu0 %v4019_v30  ;;  %v4059_v63 = vld [vmem:[#allocation5 + $0x324] ss:$16 sps:$4 sm:$0xff]   ;;  %v4062_v1 = vld [vmem:[#allocation5 + $0x320] ss:$16 sps:$4 sm:$0xff]   ;;  %v4092_v30 = vld [vmem:[#allocation5 + $0xac] ss:$16 sps:$4 sm:$0xff]  }
  0x77   :  { %1414 = vmatpush1.bf16.msra.mxu1 %v4020_v31  ;;  %1372 = vmatprep.subr.bf16.mxu0 %v4021_v32  ;;  %v4063_v2 = vld [vmem:[#allocation5 + $0x104] ss:$16 sps:$4 sm:$0xff]   ;;  %v4067_v4 = vld [vmem:[#allocation5 + $0x100] ss:$16 sps:$4 sm:$0xff]   ;;  %v4090_v32 = vld [vmem:[#allocation5 + $0xa8] ss:$16 sps:$4 sm:$0xff]  }
  0x78   :  { %1415 = vmatprep.subr.bf16.mxu1 %v4023_v33  ;;  %v4065_v3 = vld [vmem:[#allocation5 + $0x304] ss:$16 sps:$4 sm:$0xff]   ;;  %v4068_v5 = vld [vmem:[#allocation5 + $0x300] ss:$16 sps:$4 sm:$0xff]  }
  0x79   :  { %v133_v6 = vld [vmem:[#allocation2] sm:$0xff]  ;;  %v135_v8 = vld [vmem:[#allocation2 + $0x10] sm:$0xff] }
  0x7a   :  { %1373 = vmatpush2.bf16.msra.mxu0 %v4025_v34  ;;  %v4071_v10 = vld [vmem:[#allocation5 + $0x4e4] ss:$16 sps:$4 sm:$0xff]   ;;  %v4864_v12 = vpack.c.bf16 %v140_v7, %v133_v6  ;;  %v4866_v13 = vpack.c.bf16 %v142_v9, %v135_v8  ;;  %v4069_v14 = vld [vmem:[#allocation5 + $0x4e0] ss:$16 sps:$4 sm:$0xff]   ;;  %v4098_v34 = vld [vmem:[#allocation5 + $0x8c] ss:$16 sps:$4 sm:$0xff]  }
  0x7b   :  { %1416 = vmatpush2.bf16.msra.mxu1 %v4026_v35  ;;  %1374 = vmatprep.subr.bf16.mxu0 %v4027_v36  ;;  %v4074_v11 = vld [vmem:[#allocation5 + $0x604] ss:$16 sps:$4 sm:$0xff]   ;;  %v4072_v15 = vld [vmem:[#allocation5 + $0x600] ss:$16 sps:$4 sm:$0xff]   ;;  %v4096_v36 = vld [vmem:[#allocation5 + $0x88] ss:$16 sps:$4 sm:$0xff]  }
  0x7c   :  { %1417 = vmatprep.subr.bf16.mxu1 %v4029_v37  ;;  %v4077_v16 = vld [vmem:[#allocation5 + $0x4c4] ss:$16 sps:$4 sm:$0xff]   ;;  %v4075_v18 = vld [vmem:[#allocation5 + $0x4c0] ss:$16 sps:$4 sm:$0xff]   ;;  %v4146_v6 = vld [vmem:[#allocation5 + $0x18c] ss:$16 sps:$4 sm:$0xff]  }
  0x7d   :  { %v139_v19 = vld [vmem:[#allocation2 + $0x30] sm:$0xff]  ;;  %v4144_v8 = vld [vmem:[#allocation5 + $0x188] ss:$16 sps:$4 sm:$0xff]  }
  0x7e   :  { %1375 = vmatpush2.bf16.msra.mxu0 %v4031_v38  ;;  %v4083_v22 = vld [vmem:[#allocation5 + $0x4a4] ss:$16 sps:$4 sm:$0xff]   ;;  %v4871_v23 = vpack.c.bf16 %v146_v20, %v139_v19  ;;  %v4081_v25 = vld [vmem:[#allocation5 + $0x4a0] ss:$16 sps:$4 sm:$0xff]   ;;  %v4104_v38 = vld [vmem:[#allocation5 + $0x6c] ss:$16 sps:$4 sm:$0xff]  }
  0x7f   :  { %1418 = vmatpush2.bf16.msra.mxu1 %v4032_v39  ;;  %1376 = vmatprep.subr.bf16.mxu0 %v4033_v40  ;;  %v4089_v27 = vld [vmem:[#allocation5 + $0x484] ss:$16 sps:$4 sm:$0xff]   ;;  %v4087_v29 = vld [vmem:[#allocation5 + $0x480] ss:$16 sps:$4 sm:$0xff]   ;;  %v4102_v40 = vld [vmem:[#allocation5 + $0x68] ss:$16 sps:$4 sm:$0xff]  }
  0x80   :  { %1419 = vmatprep.subr.bf16.mxu1 %v4035_v41  ;;  %v4095_v31 = vld [vmem:[#allocation5 + $0x464] ss:$16 sps:$4 sm:$0xff]   ;;  %v4093_v33 = vld [vmem:[#allocation5 + $0x460] ss:$16 sps:$4 sm:$0xff]   ;;  %v138_v41 = vld [vmem:[#allocation2 + $0x28] sm:$0xff] }
  0x81   :  { %v4101_v35 = vld [vmem:[#allocation5 + $0x444] ss:$16 sps:$4 sm:$0xff]   ;;  %v4099_v37 = vld [vmem:[#allocation5 + $0x440] ss:$16 sps:$4 sm:$0xff]  }
  0x82   :  { %1377 = vmatpush2.bf16.msra.mxu0 %v4037_v42  ;;  %v4107_v39 = vld [vmem:[#allocation5 + $0x424] ss:$16 sps:$4 sm:$0xff]   ;;  %v4111_v48 = vld [vmem:[#allocation5 + $0x400] ss:$16 sps:$4 sm:$0xff]  }
  0x83   :  { %1420 = vmatpush2.bf16.msra.mxu1 %v4038_v43  ;;  %1378 = vmatprep.subr.bf16.mxu0 %v4039_v44  ;;  %v145_v42 = vld [vmem:[#allocation2 + $0x60] sm:$0xff] }
  0x84   :  { %1421 = vmatprep.subr.bf16.mxu1 %v4041_v45  ;;  %v4105_v43 = vld [vmem:[#allocation5 + $0x420] ss:$16 sps:$4 sm:$0xff]   ;;  %v4876_v44 = vpack.c.bf16 %v145_v42, %v138_v41  ;;  %v4110_v45 = vld [vmem:[#allocation5 + $0x4c] ss:$16 sps:$4 sm:$0xff]   ;;  %v4113_v46 = vld [vmem:[#allocation5 + $0x404] ss:$16 sps:$4 sm:$0xff]  }
  0x85   :  { %v4149_v7 = vld [vmem:[#allocation5 + $0x544] ss:$16 sps:$4 sm:$0xff]   ;;  %v4147_v9 = vld [vmem:[#allocation5 + $0x540] ss:$16 sps:$4 sm:$0xff]   ;;  %v4188_v41 = vld [vmem:[#allocation5 + $0x4ac] ss:$16 sps:$4 sm:$0xff]  }
  0x86   :  { %1379 = vmatpush2.bf16.msra.mxu0 %v4043_v50  ;;  %v4119_v50 = vld [vmem:[#allocation5 + $0x5e4] ss:$16 sps:$4 sm:$0xff]   ;;  %v4159_v19 = vld [vmem:[#allocation5 + $0x500] ss:$16 sps:$4 sm:$0xff]   ;;  %v4191_v42 = vld [vmem:[#allocation5 + $0x26c] ss:$16 sps:$4 sm:$0xff]  }
  0x87   :  { %1422 = vmatpush2.bf16.msra.mxu1 %v4044_v51  ;;  %1380 = vmatprep.subr.bf16.mxu0 %v4045_v52  ;;  %v4114_v51 = vld [vmem:[#allocation5 + $0x28] ss:$16 sps:$4 sm:$0xff]   ;;  %v4117_v52 = vld [vmem:[#allocation5 + $0x5e0] ss:$16 sps:$4 sm:$0xff]  }
  0x88   :  { %1423 = vmatprep.subr.bf16.mxu1 %v4047_v55  ;;  %v4125_v55 = vld [vmem:[#allocation5 + $0x5c4] ss:$16 sps:$4 sm:$0xff]  }
  0x89   :  { %v137_v20 = vld [vmem:[#allocation2 + $0x20] sm:$0xff] }
  0x8a   :  { %1381 = vmatpush2.bf16.msra.mxu0 %v4049_v56  ;;  %v4120_v56 = vld [vmem:[#allocation5 + $0x8] ss:$16 sps:$4 sm:$0xff]  }
  0x8b   :  { %1424 = vmatpush2.bf16.msra.mxu1 %v4050_v57  ;;  %1382 = vmatprep.subr.bf16.mxu0 %v4051_v58  ;;  %v4123_v57 = vld [vmem:[#allocation5 + $0x5c0] ss:$16 sps:$4 sm:$0xff]   ;;  %v4128_v58 = vld [vmem:[#allocation5 + $0x1ec] ss:$16 sps:$4 sm:$0xff]  }
  0x8c   :  { %1425 = vmatprep.subr.bf16.mxu1 %v4053_v59  ;;  %v4131_v59 = vld [vmem:[#allocation5 + $0x5a4] ss:$16 sps:$4 sm:$0xff]  }
  0x8e   :  { %1383 = vmatpush2.bf16.msra.mxu0 %v4055_v60  ;;  %v4126_v60 = vld [vmem:[#allocation5 + $0x1e8] ss:$16 sps:$4 sm:$0xff]  }
  0x8f   :  { %1426 = vmatpush2.bf16.msra.mxu1 %v4056_v61  ;;  %1384 = vmatprep.subr.bf16.mxu0 %v4057_v62  ;;  %v4129_v61 = vld [vmem:[#allocation5 + $0x5a0] ss:$16 sps:$4 sm:$0xff]   ;;  %v4134_v62 = vld [vmem:[#allocation5 + $0x1cc] ss:$16 sps:$4 sm:$0xff]  }
  0x90   :  { %1427 = vmatprep.subr.bf16.mxu1 %v4059_v63  ;;  %v4137_v63 = vld [vmem:[#allocation5 + $0x584] ss:$16 sps:$4 sm:$0xff]  }
  0x92   :  { %1385 = vmatpush2.bf16.msra.mxu0 %v4061_v0  ;;  %v4132_v0 = vld [vmem:[#allocation5 + $0x1c8] ss:$16 sps:$4 sm:$0xff]  }
  0x93   :  { %1428 = vmatpush2.bf16.msra.mxu1 %v4062_v1  ;;  %1386 = vmatprep.subr.bf16.mxu0 %v4063_v2  ;;  %v4135_v1 = vld [vmem:[#allocation5 + $0x580] ss:$16 sps:$4 sm:$0xff]   ;;  %v4140_v2 = vld [vmem:[#allocation5 + $0x1ac] ss:$16 sps:$4 sm:$0xff]  }
  0x94   :  { %1429 = vmatprep.subr.bf16.mxu1 %v4065_v3  ;;  %v4143_v3 = vld [vmem:[#allocation5 + $0x564] ss:$16 sps:$4 sm:$0xff]  }
  0x96   :  { %1387 = vmatpush2.bf16.msra.mxu0 %v4067_v4  ;;  %v4138_v4 = vld [vmem:[#allocation5 + $0x1a8] ss:$16 sps:$4 sm:$0xff]  }
  0x97   :  { %1430 = vmatpush2.bf16.msra.mxu1 %v4068_v5  ;;  %1442 = vmatprep.subr.bf16.mxu0 %v4071_v10  ;;  %v4141_v5 = vld [vmem:[#allocation5 + $0x560] ss:$16 sps:$4 sm:$0xff]   ;;  %v4152_v10 = vld [vmem:[#allocation5 + $0x16c] ss:$16 sps:$4 sm:$0xff]  }
  0x98   :  { %1499 = vmatprep.subr.bf16.mxu1 %v4074_v11  ;;  %v4155_v11 = vld [vmem:[#allocation5 + $0x524] ss:$16 sps:$4 sm:$0xff]  }
  0x99   :  { %1389 = vmatmul.mubr.bf16.vlgmr.msra.gmra.mxu0 %v4864_v12 }
  0x9a   :  { %1432 = vmatmul.mubr.bf16.vlgmr.msra.gmra.mxu1 %v4866_v13  ;;  %1443 = vmatpush1.bf16.msra.mxu0 %v4069_v14  ;;  %v4150_v14 = vld [vmem:[#allocation5 + $0x168] ss:$16 sps:$4 sm:$0xff]  }
  0x9b   :  { %1500 = vmatpush1.bf16.msra.mxu1 %v4072_v15  ;;  %1444 = vmatprep.subr.bf16.mxu0 %v4077_v16  ;;  %v4153_v15 = vld [vmem:[#allocation5 + $0x520] ss:$16 sps:$4 sm:$0xff]   ;;  %v4158_v16 = vld [vmem:[#allocation5 + $0x14c] ss:$16 sps:$4 sm:$0xff]  }
  0x9c   :  { %1517 = vmatprep.mubr.bf16.mxu1 %v4764_v21  ;;  %1528 = vmatprep.subr.bf16.mxu1 %v4080_v17  ;;  %v4161_v17 = vld [vmem:[#allocation5 + $0x504] ss:$16 sps:$4 sm:$0xff]  }
  0x9d   :  { %1474 = vmatprep.mubr.bf16.mxu0 %v4876_v44 }
  0x9e   :  { %1445 = vmatpush1.bf16.msra.mxu0 %v4075_v18  ;;  %v4156_v18 = vld [vmem:[#allocation5 + $0x148] ss:$16 sps:$4 sm:$0xff]  }
  0x9f   :  { %1446 = vmatprep.subr.bf16.mxu0 %v4083_v22  ;;  %v144_v22 = vld [vmem:[#allocation2 + $0x58] sm:$0xff] }
  0xa2   :  { %3683 = vmatmul.mubr.msk.bf16.vlgmr.msra.gmra.mxu1 %vm1352_vm0, %v4871_v23  ;;  %1447 = vmatpush1.bf16.msra.mxu0 %v4081_v25  ;;  %v4167_v25 = vld [vmem:[#allocation5 + $0x2ec] ss:$16 sps:$4 sm:$0xff]  }
  0xa3   :  { %1529 = vmatpush1.bf16.msra.mxu1 %v4078_v24  ;;  %1448 = vmatprep.subr.bf16.mxu0 %v4089_v27  ;;  %v4164_v24 = vld [vmem:[#allocation5 + $0x12c] ss:$16 sps:$4 sm:$0xff]   ;;  %v4162_v27 = vld [vmem:[#allocation5 + $0x128] ss:$16 sps:$4 sm:$0xff]  }
  0xa4   :  { %1530 = vmatprep.subr.bf16.mxu1 %v4086_v26  ;;  %1560 = vmatprep.mubr.bf16.mxu1 %v4858_v53  ;;  %v4122_v53 = vld [vmem:[#allocation5 + $0xc] ss:$16 sps:$4 sm:$0xff]   ;;  %v4879_v26 = vpack.c.bf16 %v144_v22, %v137_v20  ;;  %v4246_v20 = vld [vmem:[#allocation5 + $0x568] ss:$16 sps:$4 sm:$0xff]  }
  0xa5   :  { %v4249_v22 = vld [vmem:[#allocation5 + $0x328] ss:$16 sps:$4 sm:$0xff]  }
  0xa6   :  { %1449 = vmatpush1.bf16.msra.mxu0 %v4087_v29  ;;  %v4170_v29 = vld [vmem:[#allocation5 + $0x10c] ss:$16 sps:$4 sm:$0xff]  }
  0xa7   :  { %1531 = vmatpush1.bf16.msra.mxu1 %v4084_v28  ;;  %1450 = vmatprep.subr.bf16.mxu0 %v4095_v31  ;;  %v4165_v28 = vld [vmem:[#allocation5 + $0x2e8] ss:$16 sps:$4 sm:$0xff]  }
  0xa8   :  { %1532 = vmatprep.subr.bf16.mxu1 %v4092_v30  ;;  %v4173_v30 = vld [vmem:[#allocation5 + $0x2cc] ss:$16 sps:$4 sm:$0xff]   ;;  %v4168_v31 = vld [vmem:[#allocation5 + $0x108] ss:$16 sps:$4 sm:$0xff]  }
  0xaa   :  { %1451 = vmatpush1.bf16.msra.mxu0 %v4093_v33  ;;  %v4176_v33 = vld [vmem:[#allocation5 + $0x4ec] ss:$16 sps:$4 sm:$0xff]  }
  0xab   :  { %1533 = vmatpush1.bf16.msra.mxu1 %v4090_v32  ;;  %1452 = vmatprep.subr.bf16.mxu0 %v4101_v35  ;;  %v4171_v32 = vld [vmem:[#allocation5 + $0x2c8] ss:$16 sps:$4 sm:$0xff]  }
  0xac   :  { %1534 = vmatprep.subr.bf16.mxu1 %v4098_v34  ;;  %v4179_v34 = vld [vmem:[#allocation5 + $0x2ac] ss:$16 sps:$4 sm:$0xff]   ;;  %v4174_v35 = vld [vmem:[#allocation5 + $0x4e8] ss:$16 sps:$4 sm:$0xff]  }
  0xae   :  { %1453 = vmatpush1.bf16.msra.mxu0 %v4099_v37  ;;  %v4182_v37 = vld [vmem:[#allocation5 + $0x4cc] ss:$16 sps:$4 sm:$0xff]  }
  0xaf   :  { %1535 = vmatpush1.bf16.msra.mxu1 %v4096_v36  ;;  %1454 = vmatprep.subr.bf16.mxu0 %v4107_v39  ;;  %v4177_v36 = vld [vmem:[#allocation5 + $0x2a8] ss:$16 sps:$4 sm:$0xff]  }
  0xb0   :  { %1536 = vmatprep.subr.bf16.mxu1 %v4104_v38  ;;  %v4185_v38 = vld [vmem:[#allocation5 + $0x28c] ss:$16 sps:$4 sm:$0xff]   ;;  %v4180_v39 = vld [vmem:[#allocation5 + $0x4c8] ss:$16 sps:$4 sm:$0xff]  }
  0xb2   :  { %1455 = vmatpush1.bf16.msra.mxu0 %v4105_v43  ;;  %v4186_v43 = vld [vmem:[#allocation5 + $0x4a8] ss:$16 sps:$4 sm:$0xff]  }
  0xb3   :  { %1537 = vmatpush1.bf16.msra.mxu1 %v4102_v40  ;;  %1456 = vmatprep.subr.bf16.mxu0 %v4113_v46  ;;  %v4183_v40 = vld [vmem:[#allocation5 + $0x288] ss:$16 sps:$4 sm:$0xff]   ;;  %v4197_v46 = vld [vmem:[#allocation5 + $0x24c] ss:$16 sps:$4 sm:$0xff]  }
  0xb4   :  { %1538 = vmatprep.subr.bf16.mxu1 %v4110_v45  ;;  %v4189_v45 = vld [vmem:[#allocation5 + $0x268] ss:$16 sps:$4 sm:$0xff]  }
  0xb6   :  { %1457 = vmatpush1.bf16.msra.mxu0 %v4111_v48  ;;  %v4200_v48 = vld [vmem:[#allocation5 + $0x46c] ss:$16 sps:$4 sm:$0xff]  }
  0xb7   :  { %1539 = vmatpush1.bf16.msra.mxu1 %v4108_v47  ;;  %1458 = vmatprep.subr.bf16.mxu0 %v4119_v50  ;;  %v4192_v47 = vld [vmem:[#allocation5 + $0x488] ss:$16 sps:$4 sm:$0xff]  }
  0xb8   :  { %1540 = vmatprep.subr.bf16.mxu1 %v4116_v49  ;;  %v4203_v49 = vld [vmem:[#allocation5 + $0x22c] ss:$16 sps:$4 sm:$0xff]   ;;  %v4198_v50 = vld [vmem:[#allocation5 + $0x468] ss:$16 sps:$4 sm:$0xff]  }
  0xba   :  { %1459 = vmatpush2.bf16.msra.mxu0 %v4117_v52  ;;  %v4209_v52 = vld [vmem:[#allocation5 + $0x20c] ss:$16 sps:$4 sm:$0xff]  }
  0xbb   :  { %1541 = vmatpush1.bf16.msra.mxu1 %v4114_v51  ;;  %1460 = vmatprep.subr.bf16.mxu0 %v4125_v55  ;;  %v4201_v51 = vld [vmem:[#allocation5 + $0x228] ss:$16 sps:$4 sm:$0xff]  }
  0xbc   :  { %1542 = vmatprep.subr.bf16.mxu1 %v4122_v53  ;;  %v4204_v53 = vld [vmem:[#allocation5 + $0x448] ss:$16 sps:$4 sm:$0xff]  }
  0xbd   :  { %v4207_v55 = vld [vmem:[#allocation5 + $0x208] ss:$16 sps:$4 sm:$0xff]  }
  0xbe   :  { %1461 = vmatpush2.bf16.msra.mxu0 %v4123_v57  ;;  %v4215_v57 = vld [vmem:[#allocation5 + $0x3ec] ss:$16 sps:$4 sm:$0xff]  }
  0xbf   :  { %1543 = vmatpush1.bf16.msra.mxu1 %v4120_v56  ;;  %1462 = vmatprep.subr.bf16.mxu0 %v4131_v59  ;;  %v4212_v56 = vld [vmem:[#allocation5 + $0x42c] ss:$16 sps:$4 sm:$0xff]   ;;  %v4213_v59 = vld [vmem:[#allocation5 + $0x3e8] ss:$16 sps:$4 sm:$0xff]  }
  0xc0   :  { %1544 = vmatprep.subr.bf16.mxu1 %v4128_v58  ;;  %v4210_v58 = vld [vmem:[#allocation5 + $0x428] ss:$16 sps:$4 sm:$0xff]  }
  0xc2   :  { %1463 = vmatpush2.bf16.msra.mxu0 %v4129_v61  ;;  %v4221_v61 = vld [vmem:[#allocation5 + $0x3cc] ss:$16 sps:$4 sm:$0xff]  }
  0xc3   :  { %1545 = vmatpush2.bf16.msra.mxu1 %v4126_v60  ;;  %1464 = vmatprep.subr.bf16.mxu0 %v4137_v63  ;;  %v4218_v60 = vld [vmem:[#allocation5 + $0x40c] ss:$16 sps:$4 sm:$0xff]   ;;  %v4219_v63 = vld [vmem:[#allocation5 + $0x3c8] ss:$16 sps:$4 sm:$0xff]  }
  0xc4   :  { %1546 = vmatprep.subr.bf16.mxu1 %v4134_v62  ;;  %v4216_v62 = vld [vmem:[#allocation5 + $0x408] ss:$16 sps:$4 sm:$0xff]  }
  0xc6   :  { %1465 = vmatpush2.bf16.msra.mxu0 %v4135_v1  ;;  %v4227_v1 = vld [vmem:[#allocation5 + $0x3ac] ss:$16 sps:$4 sm:$0xff]  }
  0xc7   :  { %1547 = vmatpush2.bf16.msra.mxu1 %v4132_v0  ;;  %1466 = vmatprep.subr.bf16.mxu0 %v4143_v3  ;;  %v4224_v0 = vld [vmem:[#allocation5 + $0x5ec] ss:$16 sps:$4 sm:$0xff]   ;;  %v4225_v3 = vld [vmem:[#allocation5 + $0x3a8] ss:$16 sps:$4 sm:$0xff]  }
  0xc8   :  { %1548 = vmatprep.subr.bf16.mxu1 %v4140_v2  ;;  %v4222_v2 = vld [vmem:[#allocation5 + $0x5e8] ss:$16 sps:$4 sm:$0xff]  }
  0xca   :  { %1467 = vmatpush2.bf16.msra.mxu0 %v4141_v5  ;;  %v4233_v5 = vld [vmem:[#allocation5 + $0x38c] ss:$16 sps:$4 sm:$0xff]  }
  0xcb   :  { %1549 = vmatpush2.bf16.msra.mxu1 %v4138_v4  ;;  %1468 = vmatprep.subr.bf16.mxu0 %v4149_v7  ;;  %v4230_v4 = vld [vmem:[#allocation5 + $0x5cc] ss:$16 sps:$4 sm:$0xff]   ;;  %v4231_v7 = vld [vmem:[#allocation5 + $0x388] ss:$16 sps:$4 sm:$0xff]  }
  0xcc   :  { %1550 = vmatprep.subr.bf16.mxu1 %v4146_v6  ;;  %v4228_v6 = vld [vmem:[#allocation5 + $0x5c8] ss:$16 sps:$4 sm:$0xff]  }
  0xce   :  { %1469 = vmatpush2.bf16.msra.mxu0 %v4147_v9  ;;  %v4239_v9 = vld [vmem:[#allocation5 + $0x36c] ss:$16 sps:$4 sm:$0xff]  }
  0xcf   :  { %1551 = vmatpush2.bf16.msra.mxu1 %v4144_v8  ;;  %1470 = vmatprep.subr.bf16.mxu0 %v4155_v11  ;;  %v4236_v8 = vld [vmem:[#allocation5 + $0x5ac] ss:$16 sps:$4 sm:$0xff]   ;;  %v4237_v11 = vld [vmem:[#allocation5 + $0x368] ss:$16 sps:$4 sm:$0xff]  }
  0xd0   :  { %1552 = vmatprep.subr.bf16.mxu1 %v4152_v10  ;;  %v4234_v10 = vld [vmem:[#allocation5 + $0x5a8] ss:$16 sps:$4 sm:$0xff]  }
  0xd2   :  { %1471 = vmatpush2.bf16.msra.mxu0 %v4153_v15  ;;  %v4245_v15 = vld [vmem:[#allocation5 + $0x34c] ss:$16 sps:$4 sm:$0xff]  }
  0xd3   :  { %1553 = vmatpush2.bf16.msra.mxu1 %v4150_v14  ;;  %1472 = vmatprep.subr.bf16.mxu0 %v4161_v17  ;;  %v4242_v14 = vld [vmem:[#allocation5 + $0x58c] ss:$16 sps:$4 sm:$0xff]   ;;  %v4243_v17 = vld [vmem:[#allocation5 + $0x348] ss:$16 sps:$4 sm:$0xff]  }
  0xd4   :  { %1554 = vmatprep.subr.bf16.mxu1 %v4158_v16  ;;  %v4240_v16 = vld [vmem:[#allocation5 + $0x588] ss:$16 sps:$4 sm:$0xff]  }
  0xd6   :  { %1473 = vmatpush2.bf16.msra.mxu0 %v4159_v19  ;;  %v4251_v19 = vld [vmem:[#allocation5 + $0x32c] ss:$16 sps:$4 sm:$0xff]  }
  0xd7   :  { %1555 = vmatpush2.bf16.msra.mxu1 %v4156_v18  ;;  %1571 = vmatprep.subr.bf16.mxu0 %v4167_v25  ;;  %v4248_v18 = vld [vmem:[#allocation5 + $0x56c] ss:$16 sps:$4 sm:$0xff]  }
  0xd8   :  { %1556 = vmatprep.subr.bf16.mxu1 %v4164_v24  ;;  %v4254_v24 = vld [vmem:[#allocation5 + $0x54c] ss:$16 sps:$4 sm:$0xff]  }
  0xd9   :  { %1475 = vmatmul.mubr.bf16.vlgmr.msra.gmra.mxu0 %v4879_v26  ;;  %v4257_v25 = vld [vmem:[#allocation5 + $0x30c] ss:$16 sps:$4 sm:$0xff]  }
  0xda   :  { %1572 = vmatpush1.bf16.msra.mxu0 %v4165_v28  ;;  %1603 = vmatprep.mubr.bf16.mxu0 %v4860_v54  ;;  %v4194_v54 = vld [vmem:[#allocation5 + $0x48c] ss:$16 sps:$4 sm:$0xff]   ;;  %v4255_v28 = vld [vmem:[#allocation5 + $0x308] ss:$16 sps:$4 sm:$0xff]  }
  0xdb   :  { %1557 = vmatpush2.bf16.msra.mxu1 %v4162_v27  ;;  %1573 = vmatprep.subr.bf16.mxu0 %v4173_v30  ;;  %v4252_v27 = vld [vmem:[#allocation5 + $0x548] ss:$16 sps:$4 sm:$0xff]   ;;  %v4263_v30 = vld [vmem:[#allocation5 + $0x60c] ss:$16 sps:$4 sm:$0xff]  }
  0xdc   :  { %1558 = vmatprep.subr.bf16.mxu1 %v4170_v29  ;;  %v4260_v29 = vld [vmem:[#allocation5 + $0x52c] ss:$16 sps:$4 sm:$0xff]  }
  0xde   :  { %1574 = vmatpush1.bf16.msra.mxu0 %v4171_v32  ;;  %v4261_v32 = vld [vmem:[#allocation5 + $0x608] ss:$16 sps:$4 sm:$0xff]  }
  0xdf   :  { %1559 = vmatpush2.bf16.msra.mxu1 %v4168_v31  ;;  %1575 = vmatprep.subr.bf16.mxu0 %v4179_v34  ;;  %v4258_v31 = vld [vmem:[#allocation5 + $0x528] ss:$16 sps:$4 sm:$0xff]  }
  0xe0   :  { %1614 = vmatprep.subr.bf16.mxu1 %v4176_v33  ;;  %v4266_v33 = vld [vmem:[#allocation5 + $0x50c] ss:$16 sps:$4 sm:$0xff]   ;;  %v4269_v34 = vld [vmem:[#allocation8 + $0xe4] ss:$16 sps:$4 sm:$0xff]  }
  0xe2   :  { %1561 = vmatmul.mubr.bf16.vlgmr.msra.gmra.mxu1 %v4864_v12  ;;  %1576 = vmatpush1.bf16.msra.mxu0 %v4177_v36  ;;  %v4195_v12 = vld [vmem:[#allocation5 + $0x248] ss:$16 sps:$4 sm:$0xff]   ;;  %v4267_v36 = vld [vmem:[#allocation8 + $0xe0] ss:$16 sps:$4 sm:$0xff]  }
  0xe3   :  { %1615 = vmatpush1.bf16.msra.mxu1 %v4174_v35  ;;  %1577 = vmatprep.subr.bf16.mxu0 %v4185_v38  ;;  %v4264_v35 = vld [vmem:[#allocation5 + $0x508] ss:$16 sps:$4 sm:$0xff]   ;;  %v4270_v38 = vld [vmem:[#allocation8 + $0xc0] ss:$16 sps:$4 sm:$0xff]  }
  0xe4   :  { %1616 = vmatprep.subr.bf16.mxu1 %v4182_v37  ;;  %1646 = vmatprep.mubr.bf16.mxu1 %v4876_v44  ;;  %v4206_v44 = vld [vmem:[#allocation5 + $0x44c] ss:$16 sps:$4 sm:$0xff]   ;;  %v4272_v37 = vld [vmem:[#allocation8 + $0xc4] ss:$16 sps:$4 sm:$0xff]  }
  0xe6   :  { %1578 = vmatpush1.bf16.msra.mxu0 %v4183_v40  ;;  %v4273_v40 = vld [vmem:[#allocation8 + $0xa0] ss:$16 sps:$4 sm:$0xff]  }
  0xe7   :  { %1617 = vmatpush1.bf16.msra.mxu1 %v4180_v39  ;;  %1579 = vmatprep.subr.bf16.mxu0 %v4191_v42  ;;  %v4275_v39 = vld [vmem:[#allocation8 + $0xa4] ss:$16 sps:$4 sm:$0xff]   ;;  %v4279_v42 = vld [vmem:[#allocation8 + $0x60] ss:$16 sps:$4 sm:$0xff]  }
  0xe8   :  { %1618 = vmatprep.subr.bf16.mxu1 %v4188_v41  ;;  %v4276_v41 = vld [vmem:[#allocation8 + $0x80] ss:$16 sps:$4 sm:$0xff]  }
  0xea   :  { %1580 = vmatpush1.bf16.msra.mxu0 %v4189_v45  ;;  %v4323_v45 = vld [vmem:[#allocation8 + $0x2e4] ss:$16 sps:$4 sm:$0xff]  }
  0xeb   :  { %1619 = vmatpush1.bf16.msra.mxu1 %v4186_v43  ;;  %1581 = vmatprep.subr.bf16.mxu0 %v4197_v46  ;;  %v4321_v43 = vld [vmem:[#allocation8 + $0x2e0] ss:$16 sps:$4 sm:$0xff]   ;;  %v4329_v46 = vld [vmem:[#allocation8 + $0x2c4] ss:$16 sps:$4 sm:$0xff]  }
  0xec   :  { %1620 = vmatprep.subr.bf16.mxu1 %v4194_v54  ;;  %v4327_v54 = vld [vmem:[#allocation8 + $0x2c0] ss:$16 sps:$4 sm:$0xff]  }
  0xee   :  { %1582 = vmatpush1.bf16.msra.mxu0 %v4195_v12  ;;  %v4285_v12 = vld [vmem:[#allocation8 + $0x20] ss:$16 sps:$4 sm:$0xff]  }
  0xef   :  { %1621 = vmatpush1.bf16.msra.mxu1 %v4192_v47  ;;  %1583 = vmatprep.subr.bf16.mxu0 %v4203_v49  ;;  %v4287_v47 = vld [vmem:[#allocation8 + $0x24] ss:$16 sps:$4 sm:$0xff]  }
  0xf0   :  { %1622 = vmatprep.subr.bf16.mxu1 %v4200_v48  ;;  %v4333_v48 = vld [vmem:[#allocation8 + $0x2a0] ss:$16 sps:$4 sm:$0xff]   ;;  %v4335_v49 = vld [vmem:[#allocation8 + $0x2a4] ss:$16 sps:$4 sm:$0xff]  }
  0xf2   :  { %1584 = vmatpush1.bf16.msra.mxu0 %v4201_v51  ;;  %v4288_v51 = vld [vmem:[#allocation8] ss:$16 sps:$4 sm:$0xff]  }
  0xf3   :  { %1623 = vmatpush1.bf16.msra.mxu1 %v4198_v50  ;;  %1585 = vmatprep.subr.bf16.mxu0 %v4209_v52  ;;  %v4290_v50 = vld [vmem:[#allocation8 + $0x4] ss:$16 sps:$4 sm:$0xff]  }
  0xf4   :  { %1624 = vmatprep.subr.bf16.mxu1 %v4206_v44  ;;  %v4339_v44 = vld [vmem:[#allocation8 + $0x280] ss:$16 sps:$4 sm:$0xff]   ;;  %v4341_v52 = vld [vmem:[#allocation8 + $0x284] ss:$16 sps:$4 sm:$0xff]  }
  0xf6   :  { %1586 = vmatpush1.bf16.msra.mxu0 %v4207_v55  ;;  %v4291_v55 = vld [vmem:[#allocation8 + $0x1e0] ss:$16 sps:$4 sm:$0xff]  }
  0xf7   :  { %1625 = vmatpush1.bf16.msra.mxu1 %v4204_v53  ;;  %1587 = vmatprep.subr.bf16.mxu0 %v4215_v57  ;;  %v4293_v53 = vld [vmem:[#allocation8 + $0x1e4] ss:$16 sps:$4 sm:$0xff]  }
  0xf8   :  { %1626 = vmatprep.subr.bf16.mxu1 %v4212_v56  ;;  %v4345_v56 = vld [vmem:[#allocation8 + $0x260] ss:$16 sps:$4 sm:$0xff]   ;;  %v4347_v57 = vld [vmem:[#allocation8 + $0x264] ss:$16 sps:$4 sm:$0xff]  }
  0xfa   :  { %1588 = vmatpush2.bf16.msra.mxu0 %v4213_v59  ;;  %v4294_v59 = vld [vmem:[#allocation8 + $0x1c0] ss:$16 sps:$4 sm:$0xff]  }
  0xfb   :  { %1627 = vmatpush1.bf16.msra.mxu1 %v4210_v58  ;;  %1589 = vmatprep.subr.bf16.mxu0 %v4221_v61  ;;  %v4296_v58 = vld [vmem:[#allocation8 + $0x1c4] ss:$16 sps:$4 sm:$0xff]  }
  0xfc   :  { %1628 = vmatprep.subr.bf16.mxu1 %v4218_v60  ;;  %v4351_v60 = vld [vmem:[#allocation8 + $0x240] ss:$16 sps:$4 sm:$0xff]   ;;  %v4353_v61 = vld [vmem:[#allocation8 + $0x244] ss:$16 sps:$4 sm:$0xff]  }
  0xfe   :  { %1590 = vmatpush2.bf16.msra.mxu0 %v4219_v63  ;;  %v4297_v63 = vld [vmem:[#allocation8 + $0x1a0] ss:$16 sps:$4 sm:$0xff]  }
  0xff   :  { %1629 = vmatpush1.bf16.msra.mxu1 %v4216_v62  ;;  %1591 = vmatprep.subr.bf16.mxu0 %v4227_v1  ;;  %v4299_v62 = vld [vmem:[#allocation8 + $0x1a4] ss:$16 sps:$4 sm:$0xff]  }
 0x100   :  { %1630 = vmatprep.subr.bf16.mxu1 %v4224_v0  ;;  %v4357_v0 = vld [vmem:[#allocation8 + $0x220] ss:$16 sps:$4 sm:$0xff]   ;;  %v4359_v1 = vld [vmem:[#allocation8 + $0x224] ss:$16 sps:$4 sm:$0xff]  }
 0x102   :  { %1592 = vmatpush2.bf16.msra.mxu0 %v4225_v3  ;;  %v4300_v3 = vld [vmem:[#allocation8 + $0x180] ss:$16 sps:$4 sm:$0xff]  }
 0x103   :  { %1631 = vmatpush2.bf16.msra.mxu1 %v4222_v2  ;;  %1593 = vmatprep.subr.bf16.mxu0 %v4233_v5  ;;  %v4302_v2 = vld [vmem:[#allocation8 + $0x184] ss:$16 sps:$4 sm:$0xff]  }
 0x104   :  { %1632 = vmatprep.subr.bf16.mxu1 %v4230_v4  ;;  %v4363_v4 = vld [vmem:[#allocation8 + $0x200] ss:$16 sps:$4 sm:$0xff]   ;;  %v4365_v5 = vld [vmem:[#allocation8 + $0x204] ss:$16 sps:$4 sm:$0xff]  }
 0x106   :  { %1594 = vmatpush2.bf16.msra.mxu0 %v4231_v7  ;;  %v4303_v7 = vld [vmem:[#allocation8 + $0x160] ss:$16 sps:$4 sm:$0xff]  }
 0x107   :  { %1633 = vmatpush2.bf16.msra.mxu1 %v4228_v6  ;;  %1595 = vmatprep.subr.bf16.mxu0 %v4239_v9  ;;  %v4305_v6 = vld [vmem:[#allocation8 + $0x164] ss:$16 sps:$4 sm:$0xff]  }
 0x108   :  { %1634 = vmatprep.subr.bf16.mxu1 %v4236_v8  ;;  %v4369_v8 = vld [vmem:[#allocation8 + $0x3e0] ss:$16 sps:$4 sm:$0xff]   ;;  %v4371_v9 = vld [vmem:[#allocation8 + $0x3e4] ss:$16 sps:$4 sm:$0xff]  }
 0x10a   :  { %1596 = vmatpush2.bf16.msra.mxu0 %v4237_v11  ;;  %v4306_v11 = vld [vmem:[#allocation8 + $0x140] ss:$16 sps:$4 sm:$0xff]  }
 0x10b   :  { %1635 = vmatpush2.bf16.msra.mxu1 %v4234_v10  ;;  %1597 = vmatprep.subr.bf16.mxu0 %v4245_v15  ;;  %v4308_v10 = vld [vmem:[#allocation8 + $0x144] ss:$16 sps:$4 sm:$0xff]  }
 0x10c   :  { %1636 = vmatprep.subr.bf16.mxu1 %v4242_v14  ;;  %v4375_v14 = vld [vmem:[#allocation8 + $0x3c0] ss:$16 sps:$4 sm:$0xff]   ;;  %v4377_v15 = vld [vmem:[#allocation8 + $0x3c4] ss:$16 sps:$4 sm:$0xff]  }
 0x10e   :  { %1598 = vmatpush2.bf16.msra.mxu0 %v4243_v17  ;;  %v4309_v17 = vld [vmem:[#allocation8 + $0x120] ss:$16 sps:$4 sm:$0xff]  }
 0x10f   :  { %1637 = vmatpush2.bf16.msra.mxu1 %v4240_v16  ;;  %1599 = vmatprep.subr.bf16.mxu0 %v4251_v19  ;;  %v4311_v16 = vld [vmem:[#allocation8 + $0x124] ss:$16 sps:$4 sm:$0xff]  }
 0x110   :  { %1638 = vmatprep.subr.bf16.mxu1 %v4248_v18  ;;  %v4381_v18 = vld [vmem:[#allocation8 + $0x3a0] ss:$16 sps:$4 sm:$0xff]   ;;  %v4383_v19 = vld [vmem:[#allocation8 + $0x3a4] ss:$16 sps:$4 sm:$0xff]  }
 0x112   :  { %1600 = vmatpush2.bf16.msra.mxu0 %v4249_v22  ;;  %v4312_v22 = vld [vmem:[#allocation8 + $0x100] ss:$16 sps:$4 sm:$0xff]  }
 0x113   :  { %1639 = vmatpush2.bf16.msra.mxu1 %v4246_v20  ;;  %1601 = vmatprep.subr.bf16.mxu0 %v4257_v25  ;;  %v4314_v20 = vld [vmem:[#allocation8 + $0x104] ss:$16 sps:$4 sm:$0xff]   ;;  %v4317_v25 = vld [vmem:[#allocation8 + $0xec] ss:$16 sps:$4 sm:$0xff]  }
 0x114   :  { %1640 = vmatprep.subr.bf16.mxu1 %v4254_v24  ;;  %v4389_v24 = vld [vmem:[#allocation8 + $0x384] ss:$16 sps:$4 sm:$0xff]  }
 0x116   :  { %1602 = vmatpush2.bf16.msra.mxu0 %v4255_v28  ;;  %v4395_v28 = vld [vmem:[#allocation8 + $0x364] ss:$16 sps:$4 sm:$0xff]  }
 0x117   :  { %1641 = vmatpush2.bf16.msra.mxu1 %v4252_v27  ;;  %1671 = vmatprep.subr.bf16.mxu0 %v4263_v30  ;;  %v4387_v27 = vld [vmem:[#allocation8 + $0x380] ss:$16 sps:$4 sm:$0xff]   ;;  %v4401_v30 = vld [vmem:[#allocation8 + $0x344] ss:$16 sps:$4 sm:$0xff]  }
 0x118   :  { %1642 = vmatprep.subr.bf16.mxu1 %v4260_v29  ;;  %v4393_v29 = vld [vmem:[#allocation8 + $0x360] ss:$16 sps:$4 sm:$0xff]  }
 0x119   :  { %1604 = vmatmul.mubr.bf16.vlgmr.msra.gmra.mxu0 %v4866_v13  ;;  %v4278_v13 = vld [vmem:[#allocation8 + $0x84] ss:$16 sps:$4 sm:$0xff]  }
 0x11a   :  { %1672 = vmatpush1.bf16.msra.mxu0 %v4261_v32  ;;  %1689 = vmatprep.mubr.bf16.mxu0 %v4764_v21  ;;  %v4281_v21 = vld [vmem:[#allocation8 + $0x64] ss:$16 sps:$4 sm:$0xff]  }
 0x11b   :  { %1643 = vmatpush2.bf16.msra.mxu1 %v4258_v31  ;;  %2502 = vmatprep.subr.bf16.mxu0 %v4269_v34  ;;  %v4399_v31 = vld [vmem:[#allocation8 + $0x340] ss:$16 sps:$4 sm:$0xff]   ;;  %v4407_v32 = vld [vmem:[#allocation8 + $0x324] ss:$16 sps:$4 sm:$0xff]  }
 0x11c   :  { %1644 = vmatprep.subr.bf16.mxu1 %v4266_v33  ;;  %v4405_v33 = vld [vmem:[#allocation8 + $0x320] ss:$16 sps:$4 sm:$0xff]   ;;  %v4410_v34 = vld [vmem:[#allocation8 + $0x304] ss:$16 sps:$4 sm:$0xff]  }
 0x11f   :  { %1645 = vmatpush2.bf16.msra.mxu1 %v4264_v35  ;;  %v4408_v35 = vld [vmem:[#allocation8 + $0x300] ss:$16 sps:$4 sm:$0xff]  }
 0x120   :  { %2545 = vmatprep.subr.bf16.mxu1 %v4323_v45  ;;  %v4898_v45 = vld [vmem:[#allocation7] sm:$0xf] }
 0x121   :  { %3684 = vmatmul.mubr.msk.bf16.vlgmr.msra.gmra.mxu0 %vm1352_vm0, %v4871_v23  ;;  %v4282_v23 = vld [vmem:[#allocation8 + $0x40] ss:$16 sps:$4 sm:$0xff]  }
 0x122   :  { %1647 = vmatmul.mubr.bf16.vlgmr.msra.gmra.mxu1 %v4879_v26  ;;  %2503 = vmatpush1.bf16.msra.mxu0 %v4267_v36  ;;  %v4284_v26 = vld [vmem:[#allocation8 + $0x44] ss:$16 sps:$4 sm:$0xff]   ;;  %v4413_v36 = vld [vmem:[#allocation8 + $0x2ec] ss:$16 sps:$4 sm:$0xff]  }
 0x123   :  { %2504 = vmatprep.subr.bf16.mxu0 %v4272_v37  ;;  %2546 = vmatpush1.bf16.msra.mxu1 %v4321_v43 }
 0x124   :  { %2547 = vmatprep.subr.bf16.mxu1 %v4329_v46 }
 0x126   :  { %2505 = vmatpush1.bf16.msra.mxu0 %v4270_v38  ;;  %v352_v38 = vlaneseq }
 0x127   :  { %2506 = vmatprep.subr.bf16.mxu0 %v4275_v39  ;;  %2548 = vmatpush1.bf16.msra.mxu1 %v4327_v54 }
 0x128   :  { %2549 = vmatprep.subr.bf16.mxu1 %v4335_v49 }
 0x12a   :  { %2507 = vmatpush1.bf16.msra.mxu0 %v4273_v40  ;;  %v4890_v40 = vshrl.u32 %v352_v38, 7  ;;  %v4372_v38 = vld [vmem:[#allocation8 + $0x1a8] ss:$16 sps:$4 sm:$0xff]  }
 0x12b   :  { %2508 = vmatprep.subr.bf16.mxu0 %v4278_v13  ;;  %2550 = vmatpush1.bf16.msra.mxu1 %v4333_v48 }
 0x12c   :  { %2551 = vmatprep.subr.bf16.mxu1 %v4341_v52 }
 0x12e   :  { %2509 = vmatpush1.bf16.msra.mxu0 %v4276_v41 }
 0x12f   :  { %2510 = vmatprep.subr.bf16.mxu0 %v4281_v21  ;;  %2552 = vmatpush1.bf16.msra.mxu1 %v4339_v44  ;;  %v4893_v21 = vsub.s32 1, %v4890_v40 }
 0x130   :  { %2553 = vmatprep.subr.bf16.mxu1 %v4347_v57 }
 0x132   :  { %2511 = vmatpush1.bf16.msra.mxu0 %v4279_v42  ;;  %v4896_v42 = vsub.s32 0, %v4890_v40 }
 0x133   :  { %2512 = vmatprep.subr.bf16.mxu0 %v4284_v26  ;;  %2554 = vmatpush1.bf16.msra.mxu1 %v4345_v56 }
 0x134   :  { %2555 = vmatprep.subr.bf16.mxu1 %v4353_v61  ;;  %v355_v54 = vrot.slane %v4898_v45, %v4896_v42 }
 0x136   :  { %2513 = vmatpush1.bf16.msra.mxu0 %v4282_v23  ;;  %v359_v23 = vrot.slane %v4898_v45, %v4893_v21 }
 0x137   :  { %2514 = vmatprep.subr.bf16.mxu0 %v4287_v47  ;;  %2556 = vmatpush1.bf16.msra.mxu1 %v4351_v60 }
 0x138   :  { %2557 = vmatprep.subr.bf16.mxu1 %v4359_v1 }
 0x13a   :  { %2515 = vmatpush1.bf16.msra.mxu0 %v4285_v12 }
 0x13b   :  { %2516 = vmatprep.subr.bf16.mxu0 %v4290_v50  ;;  %2558 = vmatpush1.bf16.msra.mxu1 %v4357_v0 }
 0x13c   :  { %2559 = vmatprep.subr.bf16.mxu1 %v4365_v5 }
 0x13e   :  { %2517 = vmatpush1.bf16.msra.mxu0 %v4288_v51 }
 0x13f   :  { %2518 = vmatprep.subr.bf16.mxu0 %v4293_v53  ;;  %2560 = vmatpush1.bf16.msra.mxu1 %v4363_v4 }
 0x140   :  { %2561 = vmatprep.subr.bf16.mxu1 %v4371_v9 }
 0x142   :  { %2519 = vmatpush2.bf16.msra.mxu0 %v4291_v55 }
 0x143   :  { %2520 = vmatprep.subr.bf16.mxu0 %v4296_v58  ;;  %2562 = vmatpush2.bf16.msra.mxu1 %v4369_v8 }
 0x144   :  { %2563 = vmatprep.subr.bf16.mxu1 %v4377_v15 }
 0x146   :  { %2521 = vmatpush2.bf16.msra.mxu0 %v4294_v59 }
 0x147   :  { %2522 = vmatprep.subr.bf16.mxu0 %v4299_v62  ;;  %2564 = vmatpush2.bf16.msra.mxu1 %v4375_v14  ;;  %v4315_v14 = vld [vmem:[#allocation8 + $0xe8] ss:$16 sps:$4 sm:$0xff]  }
 0x148   :  { %2565 = vmatprep.subr.bf16.mxu1 %v4383_v19  ;;  %v4324_v19 = vld [vmem:[#allocation8 + $0xa8] ss:$16 sps:$4 sm:$0xff]  }
 0x14a   :  { %2523 = vmatpush2.bf16.msra.mxu0 %v4297_v63 }
 0x14b   :  { %2524 = vmatprep.subr.bf16.mxu0 %v4302_v2  ;;  %2566 = vmatpush2.bf16.msra.mxu1 %v4381_v18  ;;  %v4326_v18 = vld [vmem:[#allocation8 + $0xac] ss:$16 sps:$4 sm:$0xff]  }
 0x14c   :  { %2567 = vmatprep.subr.bf16.mxu1 %v4389_v24  ;;  %v4338_v24 = vld [vmem:[#allocation8 + $0x6c] ss:$16 sps:$4 sm:$0xff]  }
 0x14e   :  { %2525 = vmatpush2.bf16.msra.mxu0 %v4300_v3 }
 0x14f   :  { %2526 = vmatprep.subr.bf16.mxu0 %v4305_v6  ;;  %2568 = vmatpush2.bf16.msra.mxu1 %v4387_v27  ;;  %v4344_v27 = vld [vmem:[#allocation8 + $0x4c] ss:$16 sps:$4 sm:$0xff]  }
 0x150   :  { %2569 = vmatprep.subr.bf16.mxu1 %v4395_v28  ;;  %v4342_v28 = vld [vmem:[#allocation8 + $0x48] ss:$16 sps:$4 sm:$0xff]  }
 0x152   :  { %2527 = vmatpush2.bf16.msra.mxu0 %v4303_v7 }
 0x153   :  { %2528 = vmatprep.subr.bf16.mxu0 %v4308_v10  ;;  %2570 = vmatpush2.bf16.msra.mxu1 %v4393_v29  ;;  %v4350_v29 = vld [vmem:[#allocation8 + $0x2c] ss:$16 sps:$4 sm:$0xff]  }
 0x154   :  { %2571 = vmatprep.subr.bf16.mxu1 %v4401_v30  ;;  %v4348_v30 = vld [vmem:[#allocation8 + $0x28] ss:$16 sps:$4 sm:$0xff]  }
 0x156   :  { %2529 = vmatpush2.bf16.msra.mxu0 %v4306_v11 }
 0x157   :  { %2530 = vmatprep.subr.bf16.mxu0 %v4311_v16  ;;  %2572 = vmatpush2.bf16.msra.mxu1 %v4399_v31  ;;  %v4320_v16 = vld [vmem:[#allocation8 + $0xcc] ss:$16 sps:$4 sm:$0xff]  }
 0x158   :  { %2573 = vmatprep.subr.bf16.mxu1 %v4407_v32  ;;  %v4356_v31 = vld [vmem:[#allocation8 + $0xc] ss:$16 sps:$4 sm:$0xff]   ;;  %v4354_v32 = vld [vmem:[#allocation8 + $0x8] ss:$16 sps:$4 sm:$0xff]  }
 0x159   :  { %v1390_v13 = vpop.f32.mrf.mxu0 }
 0x15a   :  { %2531 = vmatpush2.bf16.msra.mxu0 %v4309_v17  ;;  %v1433_v37 = vpop.f32.mrf.mxu1  ;;  %v1391_v48 = vadd.f32 %v1390_v13, %v355_v54  ;;  %v4318_v17 = vld [vmem:[#allocation8 + $0xc8] ss:$16 sps:$4 sm:$0xff]  }
 0x15b   :  { %2532 = vmatprep.subr.bf16.mxu0 %v4314_v20  ;;  %2574 = vmatpush2.bf16.msra.mxu1 %v4405_v33  ;;  %v1392_v43 = vpop.f32.mrf.mxu0  ;;  %v4332_v20 = vld [vmem:[#allocation8 + $0x8c] ss:$16 sps:$4 sm:$0xff]   ;;  %v4378_v13 = vld [vmem:[#allocation8 + $0x188] ss:$16 sps:$4 sm:$0xff]  }
 0x15c   :  { %2575 = vmatprep.subr.bf16.mxu1 %v4410_v34  ;;  %v1435_v39 = vpop.f32.mrf.mxu1  ;;  %v1393_v12 = vadd.f32 %v1392_v43, %v359_v23  ;;  %v1434_v55 = vadd.f32 %v1433_v37, %v1391_v48  ;;  %v4362_v33 = vld [vmem:[#allocation8 + $0x1ec] ss:$16 sps:$4 sm:$0xff]   ;;  %v4360_v34 = vld [vmem:[#allocation8 + $0x1e8] ss:$16 sps:$4 sm:$0xff]  }
 0x15d   :  { %v1394_v46 = vpop.f32.mrf.mxu0  ;;  %v4374_v37 = vld [vmem:[#allocation8 + $0x1ac] ss:$16 sps:$4 sm:$0xff]   ;;  %v4390_v48 = vld [vmem:[#allocation8 + $0x148] ss:$16 sps:$4 sm:$0xff]  }
 0x15e   :  { %2533 = vmatpush2.bf16.msra.mxu0 %v4312_v22  ;;  %v1437_v41 = vpop.f32.mrf.mxu1  ;;  %v1395_v50 = vadd.f32 %v1394_v46, %v355_v54  ;;  %v1436_v52 = vadd.f32 %v1435_v39, %v1393_v12  ;;  %v4330_v22 = vld [vmem:[#allocation8 + $0x88] ss:$16 sps:$4 sm:$0xff]   ;;  %v4380_v39 = vld [vmem:[#allocation8 + $0x18c] ss:$16 sps:$4 sm:$0xff]   ;;  %v366_v46 = vsub.s32 3, %v4890_v40 }
 0x15f   :  { %2588 = vmatprep.subr.bf16.mxu0 %v4317_v25  ;;  %2576 = vmatpush2.bf16.msra.mxu1 %v4408_v35  ;;  %v1396_v49 = vpop.f32.mrf.mxu0  ;;  %v4336_v25 = vld [vmem:[#allocation8 + $0x68] ss:$16 sps:$4 sm:$0xff]   ;;  %v4368_v35 = vld [vmem:[#allocation8 + $0x1cc] ss:$16 sps:$4 sm:$0xff]  }
 0x160   :  { %2631 = vmatprep.subr.bf16.mxu1 %v4413_v36  ;;  %v1439_v26 = vpop.f32.mrf.mxu1  ;;  %v1397_v53 = vadd.f32 %v1396_v49, %v359_v23  ;;  %v1438_v57 = vadd.f32 %v1437_v41, %v1395_v50  ;;  %v4366_v36 = vld [vmem:[#allocation8 + $0x1c8] ss:$16 sps:$4 sm:$0xff]   ;;  %v4386_v43 = vld [vmem:[#allocation8 + $0x16c] ss:$16 sps:$4 sm:$0xff]  }
 0x161   :  { %v4392_v54 = vld [vmem:[#allocation8 + $0x14c] ss:$16 sps:$4 sm:$0xff]  }
 0x162   :  { %v1519_v47 = vpop.f32.mrf.mxu1  ;;  %v1440_v62 = vadd.f32 %v1439_v26, %v1397_v53  ;;  %v4384_v26 = vld [vmem:[#allocation8 + $0x168] ss:$16 sps:$4 sm:$0xff]  }
 0x164   :  { %v1521_v51 = vpop.f32.mrf.mxu1 }
 0x166   :  { %v1523_v59 = vpop.f32.mrf.mxu1 }
 0x168   :  { %v1525_v4 = vpop.f32.mrf.mxu1 }
 0x199   :  { %v1476_v44 = vpop.f32.mrf.mxu0 }
 0x19a   :  { %v1477_v60 = vadd.f32 %v1476_v44, %v1434_v55  ;;  %v367_v44 = vrot.slane %v4898_v45, %v366_v46  ;;  %v4396_v55 = vld [vmem:[#allocation8 + $0x128] ss:$16 sps:$4 sm:$0xff]  }
 0x19b   :  { %v1478_v56 = vpop.f32.mrf.mxu0 }
 0x19c   :  { %v1479_v58 = vadd.f32 %v1478_v56, %v1436_v52  ;;  %v1520_v5 = vadd.f32 %v1519_v47, %v1477_v60  ;;  %v362_v47 = vsub.s32 2, %v4890_v40 }
 0x19d   :  { %v1480_v61 = vpop.f32.mrf.mxu0 }
 0x19e   :  { %v1481_v63 = vadd.f32 %v1480_v61, %v1438_v57  ;;  %v1522_v1 = vadd.f32 %v1521_v51, %v1479_v58  ;;  %v1700_v10 = vmax.f32 %v1520_v5, 0.0  ;;  %v4398_v51 = vld [vmem:[#allocation8 + $0x12c] ss:$16 sps:$4 sm:$0xff]   ;;  %v363_v52 = vrot.slane %v4898_v45, %v362_v47 }
 0x19f   :  { %v1482_v0 = vpop.f32.mrf.mxu0  ;;  %v4404_v58 = vld [vmem:[#allocation8 + $0x10c] ss:$16 sps:$4 sm:$0xff]  }
 0x1a0   :  { %v1524_v2 = vadd.f32 %v1523_v59, %v1481_v63  ;;  %v1483_v3 = vadd.f32 %v1482_v0, %v1440_v62  ;;  %v1701_v8 = vmax.f32 %v1522_v1, 0.0  ;;  %v4402_v1 = vld [vmem:[#allocation8 + $0x108] ss:$16 sps:$4 sm:$0xff]  }
 0x1a2   :  { %v1526_v6 = vadd.f32 %v1525_v4, %v1483_v3  ;;  %v1704_v7 = vmax.f32 %v1524_v2, 0.0  ;;  %v1562_v41 = vpop.f32.mrf.mxu1 }
 0x1a3   :  { %v1563_v60 = vadd.f32 %v1562_v41, %v363_v52  ;;  %v4465_v41 = vld [vmem:[#allocation10 + $0x50] ss:$8 sps:$4 sm:$0xff]  }
 0x1a4   :  { %v1705_v9 = vmax.f32 %v1526_v6, 0.0  ;;  %v4904_v15 = vpack.c.bf16 %v1704_v7, %v1700_v10  ;;  %v1564_v23 = vpop.f32.mrf.mxu1 }
 0x1a5   :  { %v1565_v59 = vadd.f32 %v1564_v23, %v367_v44  ;;  %v4425_v23 = vld [vmem:[#allocation8 + $0x26c] ss:$16 sps:$4 sm:$0xff]  }
 0x1a6   :  { %v1709_v11 = vpack.c.bf16 %v1705_v9, %v1701_v8  ;;  %v1566_v49 = vpop.f32.mrf.mxu1 }
 0x1a7   :  { %v1567_v63 = vadd.f32 %v1566_v49, %v363_v52  ;;  %v4428_v49 = vld [vmem:[#allocation8 + $0x24c] ss:$16 sps:$4 sm:$0xff]  }
 0x1a8   :  { %2534 = vmatprep.mubr.bf16.mxu0 %v1709_v11  ;;  %v1568_v56 = vpop.f32.mrf.mxu1  ;;  %v4431_v52 = vld [vmem:[#allocation8 + $0x22c] ss:$16 sps:$4 sm:$0xff]  }
 0x1a9   :  { %2535 = vmatmul.mubr.bf16.vlgmr.msra.gmra.mxu0 %v4904_v15  ;;  %v1569_v45 = vadd.f32 %v1568_v56, %v367_v44  ;;  %v4426_v44 = vld [vmem:[#allocation8 + $0x248] ss:$16 sps:$4 sm:$0xff]  }
 0x1aa   :  { %2589 = vmatpush1.bf16.msra.mxu0 %v4315_v14  ;;  %2620 = vmatprep.mubr.bf16.mxu0 %v1709_v11  ;;  %v4429_v56 = vld [vmem:[#allocation8 + $0x228] ss:$16 sps:$4 sm:$0xff]  }
 0x1ab   :  { %2590 = vmatprep.subr.bf16.mxu0 %v4320_v16 }
 0x1ae   :  { %2591 = vmatpush1.bf16.msra.mxu0 %v4318_v17 }
 0x1af   :  { %2592 = vmatprep.subr.bf16.mxu0 %v4326_v18 }
 0x1b2   :  { %2593 = vmatpush1.bf16.msra.mxu0 %v4324_v19 }
 0x1b3   :  { %2594 = vmatprep.subr.bf16.mxu0 %v4332_v20 }
 0x1b6   :  { %2595 = vmatpush1.bf16.msra.mxu0 %v4330_v22 }
 0x1b7   :  { %2596 = vmatprep.subr.bf16.mxu0 %v4338_v24 }
 0x1ba   :  { %2597 = vmatpush1.bf16.msra.mxu0 %v4336_v25 }
 0x1bb   :  { %2598 = vmatprep.subr.bf16.mxu0 %v4344_v27 }
 0x1be   :  { %2599 = vmatpush1.bf16.msra.mxu0 %v4342_v28 }
 0x1bf   :  { %2600 = vmatprep.subr.bf16.mxu0 %v4350_v29 }
 0x1c2   :  { %2601 = vmatpush1.bf16.msra.mxu0 %v4348_v30  ;;  %v4411_v30 = vld [vmem:[#allocation8 + $0x2e8] ss:$16 sps:$4 sm:$0xff]  }
 0x1c3   :  { %2602 = vmatprep.subr.bf16.mxu0 %v4356_v31 }
 0x1c6   :  { %2603 = vmatpush1.bf16.msra.mxu0 %v4354_v32  ;;  %v4416_v32 = vld [vmem:[#allocation8 + $0x2cc] ss:$16 sps:$4 sm:$0xff]  }
 0x1c7   :  { %2604 = vmatprep.subr.bf16.mxu0 %v4362_v33  ;;  %v4459_v33 = vld [vmem:[#allocation10 + $0x70] ss:$8 sps:$4 sm:$0xff]  }
 0x1ca   :  { %2605 = vmatpush2.bf16.msra.mxu0 %v4360_v34  ;;  %v4461_v34 = vld [vmem:[#allocation10 + $0x74] ss:$8 sps:$4 sm:$0xff]  }
 0x1cb   :  { %2606 = vmatprep.subr.bf16.mxu0 %v4368_v35  ;;  %v4464_v35 = vld [vmem:[#allocation10 + $0x64] ss:$8 sps:$4 sm:$0xff]  }
 0x1ce   :  { %2607 = vmatpush2.bf16.msra.mxu0 %v4366_v36  ;;  %v4414_v36 = vld [vmem:[#allocation8 + $0x2c8] ss:$16 sps:$4 sm:$0xff]  }
 0x1cf   :  { %2608 = vmatprep.subr.bf16.mxu0 %v4374_v37  ;;  %v4462_v37 = vld [vmem:[#allocation10 + $0x60] ss:$8 sps:$4 sm:$0xff]  }
 0x1d2   :  { %2609 = vmatpush2.bf16.msra.mxu0 %v4372_v38  ;;  %v4467_v38 = vld [vmem:[#allocation10 + $0x54] ss:$8 sps:$4 sm:$0xff]  }
 0x1d3   :  { %2610 = vmatprep.subr.bf16.mxu0 %v4380_v39  ;;  %v4417_v39 = vld [vmem:[#allocation8 + $0x2a8] ss:$16 sps:$4 sm:$0xff]  }
 0x1d6   :  { %2611 = vmatpush2.bf16.msra.mxu0 %v4378_v13  ;;  %v4422_v13 = vld [vmem:[#allocation8 + $0x28c] ss:$16 sps:$4 sm:$0xff]  }
 0x1d7   :  { %2612 = vmatprep.subr.bf16.mxu0 %v4386_v43  ;;  %v4470_v43 = vld [vmem:[#allocation10 + $0x44] ss:$8 sps:$4 sm:$0xff]  }
 0x1d9   :  { %v1605_v12 = vpop.f32.mrf.mxu0 }
 0x1da   :  { %2613 = vmatpush2.bf16.msra.mxu0 %v4384_v26  ;;  %v1606_v2 = vadd.f32 %v1605_v12, %v1563_v60  ;;  %v4420_v26 = vld [vmem:[#allocation8 + $0x288] ss:$16 sps:$4 sm:$0xff]   ;;  %v4473_v12 = vld [vmem:[#allocation10 + $0x34] ss:$8 sps:$4 sm:$0xff]  }
 0x1db   :  { %v1607_v50 = vpop.f32.mrf.mxu0  ;;  %2614 = vmatprep.subr.bf16.mxu0 %v4392_v54  ;;  %v4468_v54 = vld [vmem:[#allocation10 + $0x40] ss:$8 sps:$4 sm:$0xff]  }
 0x1dc   :  { %v1608_v0 = vadd.f32 %v1607_v50, %v1565_v59  ;;  %v4471_v50 = vld [vmem:[#allocation10 + $0x30] ss:$8 sps:$4 sm:$0xff]   ;;  %v4482_v59 = vld [vmem:[#allocation10 + $0x4] ss:$8 sps:$4 sm:$0xff]  }
 0x1dd   :  { %v1609_v53 = vpop.f32.mrf.mxu0  ;;  %v4432_v60 = vld [vmem:[#allocation8 + $0x208] ss:$16 sps:$4 sm:$0xff]  }
 0x1de   :  { %2615 = vmatpush2.bf16.msra.mxu0 %v4390_v48  ;;  %v1610_v5 = vadd.f32 %v1609_v53, %v1567_v63  ;;  %v4423_v48 = vld [vmem:[#allocation8 + $0x268] ss:$16 sps:$4 sm:$0xff]   ;;  %v4485_v63 = vld [vmem:[#allocation10 + $0xf4] ss:$8 sps:$4 sm:$0xff]  }
 0x1df   :  { %v1611_v57 = vpop.f32.mrf.mxu0  ;;  %2616 = vmatprep.subr.bf16.mxu0 %v4398_v51  ;;  %v4476_v51 = vld [vmem:[#allocation10 + $0x24] ss:$8 sps:$4 sm:$0xff]   ;;  %v4474_v53 = vld [vmem:[#allocation10 + $0x20] ss:$8 sps:$4 sm:$0xff]  }
 0x1e0   :  { %v1612_v10 = vadd.f32 %v1611_v57, %v1569_v45  ;;  %v4434_v57 = vld [vmem:[#allocation8 + $0x20c] ss:$16 sps:$4 sm:$0xff]  }
 0x1e1   :  { %v1691_v62 = vpop.f32.mrf.mxu0  ;;  %v4443_v45 = vld [vmem:[#allocation8 + $0x3ac] ss:$16 sps:$4 sm:$0xff]  }
 0x1e2   :  { %v1648_v61 = vpop.f32.mrf.mxu1  ;;  %2617 = vmatpush2.bf16.msra.mxu0 %v4396_v55  ;;  %v4479_v55 = vld [vmem:[#allocation10 + $0x14] ss:$8 sps:$4 sm:$0xff]  }
 0x1e3   :  { %v1693_v4 = vpop.f32.mrf.mxu0  ;;  %2618 = vmatprep.subr.bf16.mxu0 %v4404_v58  ;;  %v1649_v7 = vadd.f32 %v1648_v61, %v1606_v2  ;;  %v4477_v58 = vld [vmem:[#allocation10 + $0x10] ss:$8 sps:$4 sm:$0xff]   ;;  %v4437_v61 = vld [vmem:[#allocation8 + $0x3ec] ss:$16 sps:$4 sm:$0xff]  }
 0x1e4   :  { %v1650_v3 = vpop.f32.mrf.mxu1  ;;  %v4483_v2 = vld [vmem:[#allocation10 + $0xf0] ss:$8 sps:$4 sm:$0xff]  }
 0x1e5   :  { %v1651_v6 = vadd.f32 %v1650_v3, %v1608_v0  ;;  %v1695_v9 = vpop.f32.mrf.mxu0  ;;  %v1692_v20 = vadd.f32 %v1691_v62, %v1649_v7  ;;  %v4480_v62 = vld [vmem:[#allocation10] ss:$8 sps:$4 sm:$0xff]   ;;  %v4488_v3 = vld [vmem:[#allocation10 + $0xe4] ss:$8 sps:$4 sm:$0xff]  }
 0x1e6   :  { %v1652_v8 = vpop.f32.mrf.mxu1  ;;  %2619 = vmatpush2.bf16.msra.mxu0 %v4402_v1  ;;  %v4435_v0 = vld [vmem:[#allocation8 + $0x3e8] ss:$16 sps:$4 sm:$0xff]   ;;  %v4440_v1 = vld [vmem:[#allocation8 + $0x3cc] ss:$16 sps:$4 sm:$0xff]  }
 0x1e7   :  { %v1653_v11 = vadd.f32 %v1652_v8, %v1610_v5  ;;  %v1697_v16 = vpop.f32.mrf.mxu0  ;;  %v1694_v17 = vadd.f32 %v1693_v4, %v1651_v6  ;;  %v1702_v28 = vmax.f32 %v1692_v20, 0.0  ;;  %3082 = vmatprep.subr.bf16.mxu0 %v4461_v34  ;;  %v4438_v4 = vld [vmem:[#allocation8 + $0x3c8] ss:$16 sps:$4 sm:$0xff]   ;;  %v4491_v6 = vld [vmem:[#allocation10 + $0xd4] ss:$8 sps:$4 sm:$0xff]  }
 0x1e8   :  { %v1654_v14 = vpop.f32.mrf.mxu1  ;;  %v4486_v5 = vld [vmem:[#allocation10 + $0xe0] ss:$8 sps:$4 sm:$0xff]   ;;  %v4446_v8 = vld [vmem:[#allocation8 + $0x38c] ss:$16 sps:$4 sm:$0xff]  }
 0x1e9   :  { %v1696_v18 = vadd.f32 %v1695_v9, %v1653_v11  ;;  %v1655_v19 = vadd.f32 %v1654_v14, %v1612_v10  ;;  %2621 = vmatmul.mubr.bf16.vlgmr.msra.gmra.mxu0 %v4904_v15  ;;  %v1703_v25 = vmax.f32 %v1694_v17, 0.0  ;;  %v4419_v15 = vld [vmem:[#allocation8 + $0x2ac] ss:$16 sps:$4 sm:$0xff]   ;;  %v4441_v7 = vld [vmem:[#allocation8 + $0x3a8] ss:$16 sps:$4 sm:$0xff]  }
 0x1ea   :  { %3083 = vmatpush1.bf16.msra.mxu0 %v4459_v33  ;;  %v4489_v9 = vld [vmem:[#allocation10 + $0xd0] ss:$8 sps:$4 sm:$0xff]   ;;  %v4449_v11 = vld [vmem:[#allocation8 + $0x36c] ss:$16 sps:$4 sm:$0xff]  }
 0x1eb   :  { %v1698_v22 = vadd.f32 %v1697_v16, %v1655_v19  ;;  %v1706_v24 = vmax.f32 %v1696_v18, 0.0  ;;  %3084 = vmatprep.subr.bf16.mxu0 %v4464_v35  ;;  %v4444_v10 = vld [vmem:[#allocation8 + $0x388] ss:$16 sps:$4 sm:$0xff]   ;;  %v4452_v16 = vld [vmem:[#allocation8 + $0x34c] ss:$16 sps:$4 sm:$0xff]  }
 0x1ec   :  { %v4447_v14 = vld [vmem:[#allocation8 + $0x368] ss:$16 sps:$4 sm:$0xff]   ;;  %v4455_v18 = vld [vmem:[#allocation8 + $0x32c] ss:$16 sps:$4 sm:$0xff]  }
 0x1ed   :  { %v1707_v27 = vmax.f32 %v1698_v22, 0.0  ;;  %v4916_v31 = vpack.c.bf16 %v1706_v24, %v1702_v28  ;;  %v4450_v17 = vld [vmem:[#allocation8 + $0x348] ss:$16 sps:$4 sm:$0xff]   ;;  %v4458_v20 = vld [vmem:[#allocation8 + $0x30c] ss:$16 sps:$4 sm:$0xff]  }
 0x1ee   :  { %3085 = vmatpush1.bf16.msra.mxu0 %v4462_v37  ;;  %v4453_v19 = vld [vmem:[#allocation8 + $0x328] ss:$16 sps:$4 sm:$0xff]   ;;  %v4494_v24 = vld [vmem:[#allocation10 + $0xc4] ss:$8 sps:$4 sm:$0xff]  }
 0x1ef   :  { %v1711_v29 = vpack.c.bf16 %v1707_v27, %v1703_v25  ;;  %3086 = vmatprep.subr.bf16.mxu0 %v4467_v38  ;;  %v4456_v22 = vld [vmem:[#allocation8 + $0x308] ss:$16 sps:$4 sm:$0xff]   ;;  %v4497_v27 = vld [vmem:[#allocation10 + $0xb4] ss:$8 sps:$4 sm:$0xff]   ;;  %v4506_v34 = vld [vmem:[#allocation10 + $0x84] ss:$8 sps:$4 sm:$0xff]  }
 0x1f0   :  { %v4492_v25 = vld [vmem:[#allocation10 + $0xc0] ss:$8 sps:$4 sm:$0xff]   ;;  %v4495_v28 = vld [vmem:[#allocation10 + $0xb0] ss:$8 sps:$4 sm:$0xff]   ;;  %v4512_v37 = vld [vmem:[#allocation10 + $0x164] ss:$8 sps:$4 sm:$0xff]  }
 0x1f1   :  { %2577 = vmatprep.mubr.bf16.mxu1 %v1711_v29  ;;  %v4501_v33 = vld [vmem:[#allocation10 + $0x90] ss:$8 sps:$4 sm:$0xff]   ;;  %v4504_v35 = vld [vmem:[#allocation10 + $0x80] ss:$8 sps:$4 sm:$0xff]  }
 0x1f2   :  { %2578 = vmatmul.mubr.bf16.vlgmr.msra.gmra.mxu1 %v4916_v31  ;;  %3087 = vmatpush1.bf16.msra.mxu0 %v4465_v41  ;;  %v4510_v38 = vld [vmem:[#allocation10 + $0x160] ss:$8 sps:$4 sm:$0xff]  }
 0x1f3   :  { %2632 = vmatpush1.bf16.msra.mxu1 %v4411_v30  ;;  %2663 = vmatprep.mubr.bf16.mxu1 %v1711_v29  ;;  %v4500_v29 = vld [vmem:[#allocation10 + $0xa4] ss:$8 sps:$4 sm:$0xff]   ;;  %v4498_v30 = vld [vmem:[#allocation10 + $0xa0] ss:$8 sps:$4 sm:$0xff]  }
 0x1f4   :  { %2633 = vmatprep.subr.bf16.mxu1 %v4416_v32  ;;  %3088 = vmatprep.subr.bf16.mxu0 %v4470_v43  ;;  %v4503_v32 = vld [vmem:[#allocation10 + $0x94] ss:$8 sps:$4 sm:$0xff]   ;;  %v4516_v41 = vld [vmem:[#allocation10 + $0x140] ss:$8 sps:$4 sm:$0xff]  }
 0x1f5   :  { %v4521_v43 = vld [vmem:[#allocation10 + $0x134] ss:$8 sps:$4 sm:$0xff]  }
 0x1f6   :  { %3089 = vmatpush1.bf16.msra.mxu0 %v4468_v54  ;;  %v4522_v54 = vld [vmem:[#allocation10 + $0x120] ss:$8 sps:$4 sm:$0xff]  }
 0x1f7   :  { %2634 = vmatpush1.bf16.msra.mxu1 %v4414_v36  ;;  %3090 = vmatprep.subr.bf16.mxu0 %v4473_v12  ;;  %v4509_v36 = vld [vmem:[#allocation10 + $0x174] ss:$8 sps:$4 sm:$0xff]  }
 0x1f8   :  { %2635 = vmatprep.subr.bf16.mxu1 %v4419_v15  ;;  %v4507_v15 = vld [vmem:[#allocation10 + $0x170] ss:$8 sps:$4 sm:$0xff]   ;;  %v4527_v12 = vld [vmem:[#allocation10 + $0x114] ss:$8 sps:$4 sm:$0xff]  }
 0x1fa   :  { %3091 = vmatpush1.bf16.msra.mxu0 %v4471_v50  ;;  %v4528_v50 = vld [vmem:[#allocation10 + $0x100] ss:$8 sps:$4 sm:$0xff]  }
 0x1fb   :  { %2636 = vmatpush1.bf16.msra.mxu1 %v4417_v39  ;;  %3092 = vmatprep.subr.bf16.mxu0 %v4476_v51  ;;  %v4513_v39 = vld [vmem:[#allocation10 + $0x150] ss:$8 sps:$4 sm:$0xff]   ;;  %v4533_v51 = vld [vmem:[#allocation10 + $0x1f4] ss:$8 sps:$4 sm:$0xff]  }
 0x1fc   :  { %2637 = vmatprep.subr.bf16.mxu1 %v4422_v13  ;;  %v4518_v13 = vld [vmem:[#allocation10 + $0x144] ss:$8 sps:$4 sm:$0xff]  }
 0x1fe   :  { %3093 = vmatpush1.bf16.msra.mxu0 %v4474_v53  ;;  %v4534_v53 = vld [vmem:[#allocation10 + $0x1e0] ss:$8 sps:$4 sm:$0xff]  }
 0x1ff   :  { %2638 = vmatpush1.bf16.msra.mxu1 %v4420_v26  ;;  %3094 = vmatprep.subr.bf16.mxu0 %v4479_v55  ;;  %v4519_v26 = vld [vmem:[#allocation10 + $0x130] ss:$8 sps:$4 sm:$0xff]   ;;  %v4539_v55 = vld [vmem:[#allocation10 + $0x1d4] ss:$8 sps:$4 sm:$0xff]  }
 0x200   :  { %2639 = vmatprep.subr.bf16.mxu1 %v4425_v23  ;;  %v4524_v23 = vld [vmem:[#allocation10 + $0x124] ss:$8 sps:$4 sm:$0xff]  }
 0x202   :  { %3095 = vmatpush1.bf16.msra.mxu0 %v4477_v58  ;;  %v4540_v58 = vld [vmem:[#allocation10 + $0x1c0] ss:$8 sps:$4 sm:$0xff]  }
 0x203   :  { %2640 = vmatpush1.bf16.msra.mxu1 %v4423_v48  ;;  %3096 = vmatprep.subr.bf16.mxu0 %v4482_v59  ;;  %v4525_v48 = vld [vmem:[#allocation10 + $0x110] ss:$8 sps:$4 sm:$0xff]   ;;  %v4545_v59 = vld [vmem:[#allocation10 + $0x1b4] ss:$8 sps:$4 sm:$0xff]  }
 0x204   :  { %2641 = vmatprep.subr.bf16.mxu1 %v4428_v49  ;;  %v4530_v49 = vld [vmem:[#allocation10 + $0x104] ss:$8 sps:$4 sm:$0xff]  }
 0x206   :  { %3097 = vmatpush1.bf16.msra.mxu0 %v4480_v62  ;;  %v4546_v62 = vld [vmem:[#allocation10 + $0x1a0] ss:$8 sps:$4 sm:$0xff]  }
 0x207   :  { %2642 = vmatpush1.bf16.msra.mxu1 %v4426_v44  ;;  %3098 = vmatprep.subr.bf16.mxu0 %v4485_v63  ;;  %v4531_v44 = vld [vmem:[#allocation10 + $0x1f0] ss:$8 sps:$4 sm:$0xff]   ;;  %v4551_v63 = vld [vmem:[#allocation10 + $0x194] ss:$8 sps:$4 sm:$0xff]  }
 0x208   :  { %2643 = vmatprep.subr.bf16.mxu1 %v4431_v52  ;;  %v4536_v52 = vld [vmem:[#allocation10 + $0x1e4] ss:$8 sps:$4 sm:$0xff]  }
 0x20a   :  { %3099 = vmatpush2.bf16.msra.mxu0 %v4483_v2  ;;  %v4552_v2 = vld [vmem:[#allocation10 + $0x180] ss:$8 sps:$4 sm:$0xff]  }
 0x20b   :  { %2644 = vmatpush1.bf16.msra.mxu1 %v4429_v56  ;;  %3100 = vmatprep.subr.bf16.mxu0 %v4488_v3  ;;  %v4537_v56 = vld [vmem:[#allocation10 + $0x1d0] ss:$8 sps:$4 sm:$0xff]  }
 0x20c   :  { %2645 = vmatprep.subr.bf16.mxu1 %v4434_v57  ;;  %v4542_v57 = vld [vmem:[#allocation10 + $0x1c4] ss:$8 sps:$4 sm:$0xff]  }
 0x20e   :  { %3101 = vmatpush2.bf16.msra.mxu0 %v4486_v5 }
 0x20f   :  { %2646 = vmatpush1.bf16.msra.mxu1 %v4432_v60  ;;  %3102 = vmatprep.subr.bf16.mxu0 %v4491_v6  ;;  %v4543_v60 = vld [vmem:[#allocation10 + $0x1b0] ss:$8 sps:$4 sm:$0xff]  }
 0x210   :  { %2647 = vmatprep.subr.bf16.mxu1 %v4437_v61  ;;  %v4548_v61 = vld [vmem:[#allocation10 + $0x1a4] ss:$8 sps:$4 sm:$0xff]  }
 0x212   :  { %3103 = vmatpush2.bf16.msra.mxu0 %v4489_v9 }
 0x213   :  { %2648 = vmatpush2.bf16.msra.mxu1 %v4435_v0  ;;  %3104 = vmatprep.subr.bf16.mxu0 %v4494_v24  ;;  %v4549_v0 = vld [vmem:[#allocation10 + $0x190] ss:$8 sps:$4 sm:$0xff]  }
 0x214   :  { %2649 = vmatprep.subr.bf16.mxu1 %v4440_v1  ;;  %v4554_v1 = vld [vmem:[#allocation10 + $0x184] ss:$8 sps:$4 sm:$0xff]  }
 0x216   :  { %3105 = vmatpush2.bf16.msra.mxu0 %v4492_v25 }
 0x217   :  { %2650 = vmatpush2.bf16.msra.mxu1 %v4438_v4  ;;  %3106 = vmatprep.subr.bf16.mxu0 %v4497_v27 }
 0x218   :  { %2651 = vmatprep.subr.bf16.mxu1 %v4443_v45  ;;  %v1840_v45 = vld [vmem:[%s4950_s4] sm:$0xf] }
 0x219   :  { %v1849_v6 = vrot.slane %v1840_v45, %v4893_v21 }
 0x21a   :  { %3107 = vmatpush2.bf16.msra.mxu0 %v4495_v28 }
 0x21b   :  { %2652 = vmatpush2.bf16.msra.mxu1 %v4441_v7  ;;  %3108 = vmatprep.subr.bf16.mxu0 %v4500_v29  ;;  %v1845_v7 = vrot.slane %v1840_v45, %v4896_v42 }
 0x21c   :  { %2653 = vmatprep.subr.bf16.mxu1 %v4446_v8 }
 0x21e   :  { %3109 = vmatpush2.bf16.msra.mxu0 %v4498_v30 }
 0x21f   :  { %2654 = vmatpush2.bf16.msra.mxu1 %v4444_v10  ;;  %3110 = vmatprep.subr.bf16.mxu0 %v4503_v32 }
 0x220   :  { %2655 = vmatprep.subr.bf16.mxu1 %v4449_v11 }
 0x222   :  { %3111 = vmatpush2.bf16.msra.mxu0 %v4501_v33 }
 0x223   :  { %2656 = vmatpush2.bf16.msra.mxu1 %v4447_v14  ;;  %3112 = vmatprep.subr.bf16.mxu0 %v4506_v34 }
 0x224   :  { %2657 = vmatprep.subr.bf16.mxu1 %v4452_v16 }
 0x226   :  { %3113 = vmatpush2.bf16.msra.mxu0 %v4504_v35 }
 0x227   :  { %2658 = vmatpush2.bf16.msra.mxu1 %v4450_v17 }
 0x228   :  { %2659 = vmatprep.subr.bf16.mxu1 %v4455_v18 }
 0x22b   :  { %2660 = vmatpush2.bf16.msra.mxu1 %v4453_v19 }
 0x22c   :  { %2661 = vmatprep.subr.bf16.mxu1 %v4458_v20 }
 0x22f   :  { %2662 = vmatpush2.bf16.msra.mxu1 %v4456_v22 }
 0x230   :  { %3125 = vmatprep.subr.bf16.mxu1 %v4509_v36 }
 0x232   :  { %2664 = vmatmul.mubr.bf16.vlgmr.msra.gmra.mxu1 %v4916_v31  ;;  %v4515_v31 = vld [vmem:[#allocation10 + $0x154] ss:$8 sps:$4 sm:$0xff]  }
 0x233   :  { %3126 = vmatpush1.bf16.msra.mxu1 %v4507_v15  ;;  %v1857_v15 = vrot.slane %v1840_v45, %v366_v46 }
 0x234   :  { %3127 = vmatprep.subr.bf16.mxu1 %v4512_v37  ;;  %v1853_v37 = vrot.slane %v1840_v45, %v362_v47  ;;  %v4555_v47 = vld [vmem:[#allocation11 + $0x78] sm:$0xff]   ;;  %v4570_v45 = vld [vmem:[#allocation11] sm:$0xff]  }
 0x235   :  { %3903 = vmatprep.subr.bf16.mxu0 %v4555_v47 }
 0x237   :  { %3128 = vmatpush1.bf16.msra.mxu1 %v4510_v38 }
 0x238   :  { %3129 = vmatprep.subr.bf16.mxu1 %v4515_v31 }
 0x23b   :  { %3130 = vmatpush1.bf16.msra.mxu1 %v4513_v39 }
 0x23c   :  { %3131 = vmatprep.subr.bf16.mxu1 %v4518_v13 }
 0x23f   :  { %3132 = vmatpush1.bf16.msra.mxu1 %v4516_v41 }
 0x240   :  { %3133 = vmatprep.subr.bf16.mxu1 %v4521_v43 }
 0x243   :  { %3134 = vmatpush1.bf16.msra.mxu1 %v4519_v26 }
 0x244   :  { %3135 = vmatprep.subr.bf16.mxu1 %v4524_v23 }
 0x247   :  { %3136 = vmatpush1.bf16.msra.mxu1 %v4522_v54 }
 0x248   :  { %3137 = vmatprep.subr.bf16.mxu1 %v4527_v12 }
 0x24b   :  { %3138 = vmatpush1.bf16.msra.mxu1 %v4525_v48 }
 0x24c   :  { %3139 = vmatprep.subr.bf16.mxu1 %v4530_v49 }
 0x24f   :  { %3140 = vmatpush1.bf16.msra.mxu1 %v4528_v50 }
 0x250   :  { %3141 = vmatprep.subr.bf16.mxu1 %v4533_v51 }
 0x253   :  { %3142 = vmatpush2.bf16.msra.mxu1 %v4531_v44 }
 0x254   :  { %3143 = vmatprep.subr.bf16.mxu1 %v4536_v52 }
 0x257   :  { %3144 = vmatpush2.bf16.msra.mxu1 %v4534_v53 }
 0x258   :  { %3145 = vmatprep.subr.bf16.mxu1 %v4539_v55  ;;  %v4556_v55 = vld [vmem:[#allocation11 + $0x38] sm:$0xff]  }
 0x25b   :  { %3146 = vmatpush2.bf16.msra.mxu1 %v4537_v56  ;;  %v4557_v56 = vld [vmem:[#allocation11 + $0x70] sm:$0xff]  }
 0x25c   :  { %3147 = vmatprep.subr.bf16.mxu1 %v4542_v57  ;;  %v4558_v57 = vld [vmem:[#allocation11 + $0x30] sm:$0xff]  }
 0x25f   :  { %3148 = vmatpush2.bf16.msra.mxu1 %v4540_v58  ;;  %v4559_v58 = vld [vmem:[#allocation11 + $0x68] sm:$0xff]  }
 0x260   :  { %3149 = vmatprep.subr.bf16.mxu1 %v4545_v59  ;;  %v4560_v59 = vld [vmem:[#allocation11 + $0x28] sm:$0xff]  }
 0x263   :  { %3150 = vmatpush2.bf16.msra.mxu1 %v4543_v60  ;;  %v4561_v60 = vld [vmem:[#allocation11 + $0x60] sm:$0xff]  }
 0x264   :  { %3151 = vmatprep.subr.bf16.mxu1 %v4548_v61  ;;  %v4562_v61 = vld [vmem:[#allocation11 + $0x20] sm:$0xff]  }
 0x267   :  { %3152 = vmatpush2.bf16.msra.mxu1 %v4546_v62  ;;  %v4563_v62 = vld [vmem:[#allocation11 + $0x58] sm:$0xff]  }
 0x268   :  { %3153 = vmatprep.subr.bf16.mxu1 %v4551_v63  ;;  %v4564_v63 = vld [vmem:[#allocation11 + $0x18] sm:$0xff]  }
 0x269   :  { %v2536_v3 = vpop.f32.mrf.mxu0 }
 0x26a   :  { %v2537_v16 = vadd.f32 %v2536_v3, %v1845_v7  ;;  %v4568_v3 = vld [vmem:[#allocation11 + $0x8] sm:$0xff]  }
 0x26b   :  { %3154 = vmatpush2.bf16.msra.mxu1 %v4549_v0  ;;  %v2538_v4 = vpop.f32.mrf.mxu0  ;;  %v4565_v0 = vld [vmem:[#allocation11 + $0x50] sm:$0xff]  }
 0x26c   :  { %3155 = vmatprep.subr.bf16.mxu1 %v4554_v1  ;;  %v2539_v11 = vadd.f32 %v2538_v4, %v1849_v6  ;;  %v4566_v1 = vld [vmem:[#allocation11 + $0x10] sm:$0xff]   ;;  %v4569_v4 = vld [vmem:[#allocation11 + $0x40] sm:$0xff]  }
 0x26d   :  { %v2540_v5 = vpop.f32.mrf.mxu0 }
 0x26e   :  { %v2541_v14 = vadd.f32 %v2540_v5, %v1845_v7  ;;  %v4571_v5 = vld [vmem:[#allocation13 + $0x38] sm:$0xff]   ;;  %v4572_v7 = vld [vmem:[#allocation13 + $0x30] sm:$0xff]  }
 0x26f   :  { %3156 = vmatpush2.bf16.msra.mxu1 %v4552_v2  ;;  %v2542_v9 = vpop.f32.mrf.mxu0  ;;  %v4567_v2 = vld [vmem:[#allocation11 + $0x48] sm:$0xff]  }
 0x270   :  { %v2543_v18 = vadd.f32 %v2542_v9, %v1849_v6  ;;  %v4765_v6 = vmov 0.0   ;;  %v4574_v9 = vld [vmem:[#allocation13 + $0x20] sm:$0xff]  }
 0x271   :  { %3934 = vmatprep.subr.bf16.mxu1 %v4765_v6 }
 0x2a9   :  { %v2622_v34 = vpop.f32.mrf.mxu0 }
 0x2aa   :  { %v2623_v43 = vadd.f32 %v2622_v34, %v1853_v37 }
 0x2ab   :  { %v2624_v35 = vpop.f32.mrf.mxu0 }
 0x2ac   :  { %v2625_v13 = vadd.f32 %v2624_v35, %v1857_v15 }
 0x2ad   :  { %v2626_v36 = vpop.f32.mrf.mxu0 }
 0x2ae   :  { %v2627_v41 = vadd.f32 %v2626_v36, %v1853_v37 }
 0x2af   :  { %v2628_v31 = vpop.f32.mrf.mxu0 }
 0x2b0   :  { %v2629_v23 = vadd.f32 %v2628_v31, %v1857_v15 }
 0x2b2   :  { %v2579_v8 = vpop.f32.mrf.mxu1 }
 0x2b3   :  { %v2580_v22 = vadd.f32 %v2579_v8, %v2537_v16  ;;  %v4573_v8 = vld [vmem:[#allocation13 + $0x28] sm:$0xff]  }
 0x2b4   :  { %v2581_v10 = vpop.f32.mrf.mxu1 }
 0x2b5   :  { %v2582_v19 = vadd.f32 %v2581_v10, %v2539_v11  ;;  %v2674_v30 = vmax.f32 %v2580_v22, 0.0 }
 0x2b6   :  { %v2583_v17 = vpop.f32.mrf.mxu1 }
 0x2b7   :  { %v2584_v20 = vadd.f32 %v2583_v17, %v2541_v14  ;;  %v2675_v28 = vmax.f32 %v2582_v19, 0.0  ;;  %v2750_v14 = vld [vmem:[%s4952_s6] sm:$0x3] }
 0x2b8   :  { %v2585_v24 = vpop.f32.mrf.mxu1  ;;  %v2759_v17 = vrot.slane %v2750_v14, %v4893_v21 }
 0x2b9   :  { %v2586_v25 = vadd.f32 %v2585_v24, %v2543_v18  ;;  %v2678_v27 = vmax.f32 %v2584_v20, 0.0  ;;  %v2755_v18 = vrot.slane %v2750_v14, %v4896_v42  ;;  %v4575_v42 = vld [vmem:[#allocation13 + $0x18] sm:$0xff]  }
 0x2bb   :  { %v2679_v29 = vmax.f32 %v2586_v25, 0.0  ;;  %v2682_v33 = vpack.c.bf16 %v2678_v27, %v2674_v30 }
 0x2bd   :  { %v2683_v32 = vpack.c.bf16 %v2679_v29, %v2675_v28 }
 0x2bf   :  { %3114 = vmatprep.mubr.bf16.mxu0 %v2683_v32 }
 0x2c0   :  { %3115 = vmatmul.mubr.bf16.vlgmr.msra.gmra.mxu0 %v2682_v33 }
 0x2c1   :  { %3904 = vmatpush3.bf16.msra.mxu0 %v4556_v55 }
 0x2c2   :  { %3905 = vmatprep.subr.bf16.mxu0 %v4557_v56 }
 0x2c5   :  { %3906 = vmatpush3.bf16.msra.mxu0 %v4558_v57 }
 0x2c6   :  { %3907 = vmatprep.subr.bf16.mxu0 %v4559_v58 }
 0x2c9   :  { %3908 = vmatpush3.bf16.msra.mxu0 %v4560_v59 }
 0x2ca   :  { %3909 = vmatprep.subr.bf16.mxu0 %v4561_v60 }
 0x2cd   :  { %3910 = vmatpush3.bf16.msra.mxu0 %v4562_v61 }
 0x2ce   :  { %3911 = vmatprep.subr.bf16.mxu0 %v4563_v62 }
 0x2d1   :  { %3912 = vmatpush3.bf16.msra.mxu0 %v4564_v63 }
 0x2d2   :  { %3913 = vmatprep.subr.bf16.mxu0 %v4565_v0 }
 0x2d5   :  { %3914 = vmatpush3.bf16.msra.mxu0 %v4566_v1 }
 0x2d6   :  { %3915 = vmatprep.subr.bf16.mxu0 %v4567_v2 }
 0x2d9   :  { %3916 = vmatpush3.bf16.msra.mxu0 %v4568_v3 }
 0x2da   :  { %3917 = vmatprep.subr.bf16.mxu0 %v4569_v4 }
 0x2dd   :  { %3918 = vmatpush3.bf16.msra.mxu0 %v4570_v45 }
 0x2f2   :  { %v2665_v38 = vpop.f32.mrf.mxu1 }
 0x2f3   :  { %v2666_v48 = vadd.f32 %v2665_v38, %v2623_v43 }
 0x2f4   :  { %v2667_v39 = vpop.f32.mrf.mxu1 }
 0x2f5   :  { %v2668_v54 = vadd.f32 %v2667_v39, %v2625_v13  ;;  %v2676_v46 = vmax.f32 %v2666_v48, 0.0  ;;  %v4576_v39 = vld [vmem:[#allocation13 + $0x10] sm:$0xff]   ;;  %v4577_v13 = vld [vmem:[#allocation13 + $0x8] sm:$0xff]  }
 0x2f6   :  { %v2669_v26 = vpop.f32.mrf.mxu1 }
 0x2f7   :  { %v2670_v12 = vadd.f32 %v2669_v26, %v2627_v41  ;;  %v2677_v44 = vmax.f32 %v2668_v54, 0.0  ;;  %v4578_v41 = vld [vmem:[#allocation13] sm:$0xff]   ;;  %v3877_v54 = vld [vmem:[%s4954_s8] ss:$0 sm:$0xff]  ;;  %s4719_s8 = scalar_lea.vmem %s3473_s20, 256 }
 0x2f8   :  { %v2671_v49 = vpop.f32.mrf.mxu1  ;;  %p4720_p7 = scmp.ne.s32.totalorder %s3473_s20, %s4719_s8  ;;  %p4725_p9 = scmp.lt.s32.totalorder %s4719_s8, %s4719_s8 }
 0x2f9   :  { %v2672_v50 = vadd.f32 %v2671_v49, %v2629_v23  ;;  %v2680_v51 = vmax.f32 %v2670_v12, 0.0 }
 0x2fa   :  { %p4726_p10 = por %p4725_p9, %p4724_p8 }
 0x2fb   :  { %v2681_v52 = vmax.f32 %v2672_v50, 0.0  ;;  %v2684_v40 = vpack.c.bf16 %v2680_v51, %v2676_v46 }
 0x2fc   :  { %p4727_p11 = pnand %p4726_p10, %p4720_p7 }
 0x2fd   :  { %v2685_v53 = vpack.c.bf16 %v2681_v52, %v2677_v44 }
 0x2ff   :  { %3157 = vmatprep.mubr.bf16.mxu1 %v2685_v53  ;;  %v3894_v53 = vld [vmem:[%s4956_s10] ss:$0 sm:$0xff] }
 0x300   :  { %3158 = vmatmul.mubr.bf16.vlgmr.msra.gmra.mxu1 %v2684_v40 }
 0x301   :  { %3935 = vmatpush3.bf16.msra.mxu1 %v4571_v5  ;;  %3950 = vmatprep.mubr.msk.bf16.mxu1 %vm4766_vm1, %v4765_v6 }
 0x302   :  { %3936 = vmatprep.subr.bf16.mxu1 %v4765_v6 }
 0x305   :  { %3937 = vmatpush3.bf16.msra.mxu1 %v4572_v7 }
 0x306   :  { %3938 = vmatprep.subr.bf16.mxu1 %v4765_v6 }
 0x309   :  { %3939 = vmatpush3.bf16.msra.mxu1 %v4573_v8 }
 0x30a   :  { %3940 = vmatprep.subr.bf16.mxu1 %v4765_v6 }
 0x30d   :  { %3941 = vmatpush3.bf16.msra.mxu1 %v4574_v9 }
 0x30e   :  { %3942 = vmatprep.subr.bf16.mxu1 %v4765_v6 }
 0x311   :  { %3943 = vmatpush3.bf16.msra.mxu1 %v4575_v42 }
 0x312   :  { %3944 = vmatprep.subr.bf16.mxu1 %v4765_v6 }
 0x315   :  { %3945 = vmatpush3.bf16.msra.mxu1 %v4576_v39 }
 0x316   :  { %3946 = vmatprep.subr.bf16.mxu1 %v4765_v6 }
 0x319   :  { %3947 = vmatpush3.bf16.msra.mxu1 %v4577_v13 }
 0x31a   :  { %3948 = vmatprep.subr.bf16.mxu1 %v4765_v6 }
 0x31d   :  { %3949 = vmatpush3.bf16.msra.mxu1 %v4578_v41 }
 0x380   :  { %v3116_v10 = vpop.f32.mrf.mxu0 }
 0x381   :  { %v3117_v27 = vadd.f32 %v3116_v10, %v2755_v18 }
 0x382   :  { %v3118_v11 = vpop.f32.mrf.mxu0 }
 0x383   :  { %v3119_v24 = vadd.f32 %v3118_v11, %v2759_v17 }
 0x384   :  { %v3120_v16 = vpop.f32.mrf.mxu0 }
 0x385   :  { %v3121_v25 = vadd.f32 %v3120_v16, %v2755_v18 }
 0x386   :  { %v3122_v20 = vpop.f32.mrf.mxu0 }
 0x387   :  { %v3123_v29 = vadd.f32 %v3122_v20, %v2759_v17 }
 0x3c0   :  { %v3159_v19 = vpop.f32.mrf.mxu1 }
 0x3c1   :  { %v3160_v33 = vadd.f32 %v3159_v19, %v3117_v27 }
 0x3c2   :  { %v3161_v22 = vpop.f32.mrf.mxu1 }
 0x3c3   :  { %v3162_v30 = vadd.f32 %v3161_v22, %v3119_v24  ;;  %v3168_v38 = vmax.f32 %v3160_v33, 0.0 }
 0x3c4   :  { %v3163_v28 = vpop.f32.mrf.mxu1 }
 0x3c5   :  { %v3164_v32 = vadd.f32 %v3163_v28, %v3121_v25  ;;  %v3169_v15 = vmax.f32 %v3162_v30, 0.0 }
 0x3c6   :  { %v3165_v34 = vpop.f32.mrf.mxu1 }
 0x3c7   :  { %v3166_v35 = vadd.f32 %v3165_v34, %v3123_v29  ;;  %v3170_v36 = vmax.f32 %v3164_v32, 0.0 }
 0x3c9   :  { %v3171_v37 = vmax.f32 %v3166_v35, 0.0  ;;  %v3172_v31 = vpack.c.bf16 %v3170_v36, %v3168_v38 }
 0x3cb   :  { %v3173_v21 = vpack.c.bf16 %v3171_v37, %v3169_v15 }
 0x3cd   :  { %3341 = vmatprep.mubr.bf16.mxu0 %v3173_v21 }
 0x3ce   :  { %3342 = vmatmul.mubr.bf16.vlgmr.msra.gmra.mxu0 %v3172_v31 }
 0x48e   :  { %v3919_v43 = vpop.f32.mrf.mxu0 }
 0x490   :  { %v3920_v26 = vpop.f32.mrf.mxu0 }
 0x491   :  { %v3921_v23 = vadd.f32 %v3920_v26, %v3919_v43 }
 0x492   :  { %v3922_v12 = vpop.f32.mrf.mxu0 }
 0x493   :  { %v3344_v49 = vadd.f32 %v3921_v23, %v3877_v54 }
 0x494   :  { %v3923_v48 = vpop.f32.mrf.mxu0 }
 0x495   :  { %v3924_v50 = vadd.f32 %v3923_v48, %v3922_v12  ;;  %v3350_v44 = vmax.f32 %v3344_v49, 0.0 }
 0x497   :  { %v3347_v51 = vadd.f32 %v3924_v50, %v3877_v54 }
 0x499   :  { %v3351_v52 = vmax.f32 %v3347_v51, 0.0 }
 0x49b   :  { %v3352_v46 = vpack.c.bf16 %v3351_v52, %v3350_v44 }
 0x49d   :  { %3951 = vmatmul.mubr.bf16.vlgmr.msra.gmra.mxu1 %v3352_v46 }
 0x55d   :  { %v3458_v40 = vpop.f32.mrf.mxu1 }
 0x55e   :  { %v3459_v47 = vadd.f32 %v3894_v53, %v3458_v40 }
 0x55f   :  { %v3952_v55 = vpop.f32.mrf.mxu1 }
 0x560   :  { %3465 = vst [vmem:[#allocation14] sm:$0xff] %v3459_v47 }
 0x561   :  { %v3461_v56 = vpop.f32.mrf.mxu1 }
 0x562   :  { %v3462_v57 = vadd.f32 %v3894_v53, %v3461_v56 }
 0x563   :  { %v3953_v58 = vpop.f32.mrf.mxu1 }
 0x564   :  { %3466 = vst [vmem:[#allocation14 + $0x8] sm:$0xff] %v3462_v57 }
 0x565   :  { %4730 = shalt.err (!%p4727_p11)
}
 0x566   :  { %3478 = dma.vmem_to_hbm [thread:$0]  %s3473_s20, 256, %s4957_s11, [#allocation4], %s4761_s0, %s4761_s0, %s4762_s29  }
 0x567   :  { %4747 = dma.done.wait [#allocation4], 256  }
 0x568   :  { %4748 = vsyncadd [#allocation4], 4294967040 }
 0x569   :  { %3482 = vsyncpa [#allocation3], 1 }
 0x56a   :  { %3483 = vsyncpa [#allocation6], 1 }
 0x56b   :  { %3484 = vsyncpa [#allocation9], 1 }
 0x56c   :  { %3485 = vsyncpa [#allocation12], 1 }
 0x56d   :  { %3486 = vsyncpa [#allocation4], 1 }

</bundles_post_ra>
